<compile_context>
chip_gen: v7x
topology: tpu7x:2x2x1
jax: 0.10.0
libtpu: 0.0.40
codegen_flags: <defaults>
</compile_context>

<pallas_src>
import numpy as np
import jax
import jax.numpy as jnp
from jax import lax
from jax.experimental import pallas as pl
from jax.experimental.pallas import tpu as pltpu

# Shapes implied by the module: Linear(5*24*24, 512) forces 28x28 inputs.
H_IN, W_IN = 28, 28
C1_OUT, C2_OUT = 10, 5
K = 3
H1, W1 = H_IN - K + 1, W_IN - K + 1          # 26, 26
H2, W2 = H1 - K + 1, W1 - K + 1              # 24, 24
FLAT = C2_OUT * H2 * W2                      # 2880
IN_PIX = H_IN * W_IN                         # 784
IN_PAD = 896                                 # 7 * 128  (padded K dim)
HID = 512
N_CLASSES = 10
OUT_PAD = 128                                # lane-dense padded class dim
MAX_BT = 1024                                # max batch rows per grid step


def _round_up(n, m):
    return ((n + m - 1) // m) * m


# --------------------------------------------------------------------------
# Single fused MLP kernel:
#   (Bt,896)f32 -> bf16 -> @(896,512)+b -> ReLU -> @(512,512)+b -> ReLU
#   -> @(512,128)+b  (f32 accumulation on the MXU, lane-dense 128-wide store)
# --------------------------------------------------------------------------
def mlp_kernel(x_ref, w1_ref, b1_ref, w2_ref, b2_ref, w3_ref, b3_ref, o_ref):
    # Cast f32 activations to bf16 in-kernel (VPU work hidden under the MXU).
    x = x_ref[...].astype(jnp.bfloat16)
    h = jnp.dot(x, w1_ref[...],
                preferred_element_type=jnp.float32) + b1_ref[...]
    h = jnp.maximum(h, 0.0).astype(jnp.bfloat16)
    h = jnp.dot(h, w2_ref[...],
                preferred_element_type=jnp.float32) + b2_ref[...]
    h = jnp.maximum(h, 0.0).astype(jnp.bfloat16)
    o_ref[...] = jnp.dot(h, w3_ref[...],
                         preferred_element_type=jnp.float32) + b3_ref[...]


def mlp_head(x_flat, w1, b1, w2, b2, w3, b3):
    """x_flat: (B, IN_PAD) f32.  Weights: bf16, biases: f32 (1, N)."""
    B = x_flat.shape[0]
    # Batch tile: multiple of 16 (bf16 sublane packing), capped at 1024 rows.
    bt = _round_up(max(B, 1), 16)
    if B > 16:
        # Force >=2 grid steps when the batch allows it so both v7x
        # TensorCores get work on the "parallel" batch axis.
        bt = min(bt, _round_up(-(-B // 2), 16))
    bt = min(bt, MAX_BT)
    b_pad = _round_up(B, bt)
    if b_pad != B:
        x_flat = jnp.pad(x_flat, ((0, b_pad - B), (0, 0)))
    grid = (b_pad // bt,)

    out = pl.pallas_call(
        mlp_kernel,
        out_shape=jax.ShapeDtypeStruct((b_pad, OUT_PAD), jnp.float32),
        grid=grid,
        in_specs=[
            pl.BlockSpec((bt, IN_PAD), lambda i: (i, 0)),          # activations (f32)
            pl.BlockSpec((IN_PAD, HID), lambda i: (0, 0)),         # W_eff (resident)
            pl.BlockSpec((1, HID), lambda i: (0, 0)),              # b_eff
            pl.BlockSpec((HID, HID), lambda i: (0, 0)),            # fc2 W (resident)
            pl.BlockSpec((1, HID), lambda i: (0, 0)),              # fc2 b
            pl.BlockSpec((HID, OUT_PAD), lambda i: (0, 0)),        # fc3 W (resident)
            pl.BlockSpec((1, OUT_PAD), lambda i: (0, 0)),          # fc3 b
        ],
        out_specs=pl.BlockSpec((bt, OUT_PAD), lambda i: (i, 0)),
        compiler_params=pltpu.CompilerParams(
            dimension_semantics=("parallel",)),                    # megacore / v7x
    )(x_flat, w1, b1, w2, b2, w3, b3)
    return out[:B, :N_CLASSES]


# --------------------------------------------------------------------------
# Forward pass: reshape (+ zero-pad K dim to 896) and one Pallas kernel call.
# Activations stay f32 here; the bf16 cast happens inside the kernel.
# --------------------------------------------------------------------------
@jax.jit
def old_conv_neural_net_forward(x, folded):
    B = x.shape[0]
    x_flat = x.reshape(B, IN_PIX).astype(jnp.float32)
    x_flat = jnp.pad(x_flat, ((0, 0), (0, IN_PAD - IN_PIX)))
    return mlp_head(x_flat, folded["w1"], folded["b1"],
                    folded["w2"], folded["b2"],
                    folded["w3"], folded["b3"])


# --------------------------------------------------------------------------
# One-time parameter folding (plain JAX, outside the kernel).
# Builds the exact linear map of conv1∘conv2∘flatten by pushing a pixel
# basis through the conv stack, then absorbs it into fc1.  Pads the K dim
# (784 -> 896) and the class dim (10 -> 128) with zeros.
# --------------------------------------------------------------------------
def fold_params(p):
    dn = ("NCHW", "OIHW", "NCHW")

    def conv_stack(z):
        h = lax.conv_general_dilated(z, p["cw1"], (1, 1), "VALID",
                                     dimension_numbers=dn)
        h = h + p["cb1"][None, :, None, None]
        h = lax.conv_general_dilated(h, p["cw2"], (1, 1), "VALID",
                                     dimension_numbers=dn)
        h = h + p["cb2"][None, :, None, None]
        return h.reshape(z.shape[0], -1)                    # (N, 2880), C,H,W order

    zero = jnp.zeros((1, 1, H_IN, W_IN), jnp.float32)
    b_feat = conv_stack(zero)[0]                            # bias part, (2880,)
    eye = jnp.eye(IN_PIX, dtype=jnp.float32).reshape(IN_PIX, 1, H_IN, W_IN)
    M = conv_stack(eye) - b_feat[None, :]                   # (784, 2880) linear part

    w_eff = M @ p["fw1"]                                    # (784, 512), f32 exact
    b_eff = b_feat @ p["fw1"] + p["fb1"]                    # (512,)

    # Zero-pad K dim 784 -> 896 (padded x columns are also zero => exact).
    w_eff = jnp.pad(w_eff, ((0, IN_PAD - IN_PIX), (0, 0)))
    # Zero-pad class dim 10 -> 128 (padded columns sliced off in wrapper).
    w3 = jnp.pad(p["fw3"], ((0, 0), (0, OUT_PAD - N_CLASSES)))
    b3 = jnp.pad(p["fb3"], ((0, OUT_PAD - N_CLASSES),))

    return dict(
        w1=w_eff.astype(jnp.bfloat16),
        b1=b_eff.reshape(1, -1).astype(jnp.float32),
        w2=p["fw2"].astype(jnp.bfloat16),
        b2=p["fb2"].reshape(1, -1).astype(jnp.float32),
        w3=w3.astype(jnp.bfloat16),
        b3=b3.reshape(1, -1).astype(jnp.float32),
    )


# --------------------------------------------------------------------------
# Deterministic parameter init (PyTorch-default-style uniform bounds).
# Linear weights are stored as (in, out) == W.T of PyTorch's (out, in).
# --------------------------------------------------------------------------
def init_params(key):
    ks = jax.random.split(key, 10)

    def u(k, shape, fan_in):
        bound = 1.0 / float(np.sqrt(fan_in))
        return jax.random.uniform(k, shape, jnp.float32, -bound, bound)

    return dict(
        cw1=u(ks[0], (C1_OUT, 1, K, K), 1 * K * K),
        cb1=u(ks[1], (C1_OUT,), 1 * K * K),
        cw2=u(ks[2], (C2_OUT, C1_OUT, K, K), C1_OUT * K * K),
        cb2=u(ks[3], (C2_OUT,), C1_OUT * K * K),
        fw1=u(ks[4], (FLAT, HID), FLAT),
        fb1=u(ks[5], (HID,), FLAT),
        fw2=u(ks[6], (HID, HID), HID),
        fb2=u(ks[7], (HID,), HID),
        fw3=u(ks[8], (HID, N_CLASSES), HID),
        fb3=u(ks[9], (N_CLASSES,), HID),
    )


# --------------------------------------------------------------------------
# Pure-JAX f32 reference (same math as the PyTorch module) for sanity check.
# --------------------------------------------------------------------------
def reference_forward(x, p):
    dn = ("NCHW", "OIHW", "NCHW")
    h = lax.conv_general_dilated(x, p["cw1"], (1, 1), "VALID",
                                 dimension_numbers=dn)
    h = h + p["cb1"][None, :, None, None]
    h = lax.conv_general_dilated(h, p["cw2"], (1, 1), "VALID",
                                 dimension_numbers=dn)
    h = h + p["cb2"][None, :, None, None]
    f = h.reshape(h.shape[0], -1)
    h = jnp.maximum(f @ p["fw1"] + p["fb1"], 0.0)
    h = jnp.maximum(h @ p["fw2"] + p["fb2"], 0.0)
    return h @ p["fw3"] + p["fb3"]


if __name__ == "__main__":
    key = jax.random.PRNGKey(0)
    k_param, k_x = jax.random.split(key)
    params = init_params(k_param)
    folded = fold_params(params)

    # Input shape implied by the module: (B, 1, 28, 28) -> flatten = 5*24*24.
    x = jax.random.normal(k_x, (2, 1, H_IN, W_IN), dtype=jnp.float32)

    logits = old_conv_neural_net_forward(x, folded)
    logits = jax.block_until_ready(logits)
    assert logits.shape == (2, N_CLASSES)

    ref = jax.block_until_ready(reference_forward(x, params))
    # bf16 weights for the folded 784->512 affine map => loose tolerance.
    np.testing.assert_allclose(np.asarray(logits), np.asarray(ref),
                               rtol=5e-2, atol=5e-2)

    # TODO(synk): `norm` / `normalize` exist in the module but are never
    # invoked by forward(), so they are intentionally not implemented here.
    print("KERNEL_OK")
</pallas_src>

<mosaic_0001>
module attributes {stable_mosaic.version = 11 : i64} {
  func.func @mlp_kernel(%arg0: i32, %arg1: memref<16x896xf32, #tpu.memory_space<vmem>>, %arg2: memref<896x512xbf16, #tpu.memory_space<vmem>>, %arg3: memref<1x512xf32, #tpu.memory_space<vmem>>, %arg4: memref<512x512xbf16, #tpu.memory_space<vmem>>, %arg5: memref<1x512xf32, #tpu.memory_space<vmem>>, %arg6: memref<512x128xbf16, #tpu.memory_space<vmem>>, %arg7: memref<1x128xf32, #tpu.memory_space<vmem>>, %arg8: memref<16x128xf32, #tpu.memory_space<vmem>>) attributes {dimension_semantics = [#tpu.dimension_semantics<parallel>], iteration_bounds = array<i64: 1>, scalar_prefetch = 0 : i64, scratch_operands = 0 : i64, tpu.core_type = #tpu.core_type<tc>, window_params = [{transform_indices = @transform_0, window_bounds = array<i64: 16, 896>}, {pipeline_mode = #tpu.pipeline_mode<synchronous>, transform_indices = @transform_1, window_bounds = array<i64: 896, 512>}, {pipeline_mode = #tpu.pipeline_mode<synchronous>, transform_indices = @transform_2, window_bounds = array<i64: 1, 512>}, {pipeline_mode = #tpu.pipeline_mode<synchronous>, transform_indices = @transform_3, window_bounds = array<i64: 512, 512>}, {pipeline_mode = #tpu.pipeline_mode<synchronous>, transform_indices = @transform_4, window_bounds = array<i64: 1, 512>}, {pipeline_mode = #tpu.pipeline_mode<synchronous>, transform_indices = @transform_5, window_bounds = array<i64: 512, 128>}, {pipeline_mode = #tpu.pipeline_mode<synchronous>, transform_indices = @transform_6, window_bounds = array<i64: 1, 128>}, {transform_indices = @transform_7, window_bounds = array<i64: 16, 128>}]} {
    %c0 = arith.constant 0 : index
    %c0_0 = arith.constant 0 : index
    %0 = vector.load %arg1[%c0, %c0_0] : memref<16x896xf32, #tpu.memory_space<vmem>>, vector<16x896xf32>
    %1 = arith.truncf %0 : vector<16x896xf32> to vector<16x896xbf16>
    %c0_1 = arith.constant 0 : index
    %c0_2 = arith.constant 0 : index
    %2 = vector.load %arg2[%c0_1, %c0_2] : memref<896x512xbf16, #tpu.memory_space<vmem>>, vector<896x512xbf16>
    %cst = arith.constant dense<0.000000e+00> : vector<16x512xf32>
    %3 = tpu.matmul %1, %2, %cst {dimension_numbers = #tpu.dot_dimension_numbers<[1], [0], [0], [1], [0, 0, 1, 1], [], []>} : vector<16x896xbf16>, vector<896x512xbf16>, vector<16x512xf32> -> vector<16x512xf32>
    %c0_3 = arith.constant 0 : index
    %c0_4 = arith.constant 0 : index
    %4 = vector.load %arg3[%c0_3, %c0_4] : memref<1x512xf32, #tpu.memory_space<vmem>>, vector<1x512xf32>
    %5 = vector.broadcast %4 : vector<1x512xf32> to vector<16x512xf32>
    %6 = arith.addf %3, %5 : vector<16x512xf32>
    %cst_5 = arith.constant 0.000000e+00 : f32
    %7 = vector.broadcast %cst_5 : f32 to vector<16x512xf32>
    %8 = arith.maximumf %6, %7 : vector<16x512xf32>
    %9 = arith.truncf %8 : vector<16x512xf32> to vector<16x512xbf16>
    %c0_6 = arith.constant 0 : index
    %c0_7 = arith.constant 0 : index
    %10 = vector.load %arg4[%c0_6, %c0_7] : memref<512x512xbf16, #tpu.memory_space<vmem>>, vector<512x512xbf16>
    %cst_8 = arith.constant dense<0.000000e+00> : vector<16x512xf32>
    %11 = tpu.matmul %9, %10, %cst_8 {dimension_numbers = #tpu.dot_dimension_numbers<[1], [0], [0], [1], [0, 0, 1, 1], [], []>} : vector<16x512xbf16>, vector<512x512xbf16>, vector<16x512xf32> -> vector<16x512xf32>
    %c0_9 = arith.constant 0 : index
    %c0_10 = arith.constant 0 : index
    %12 = vector.load %arg5[%c0_9, %c0_10] : memref<1x512xf32, #tpu.memory_space<vmem>>, vector<1x512xf32>
    %13 = vector.broadcast %12 : vector<1x512xf32> to vector<16x512xf32>
    %14 = arith.addf %11, %13 : vector<16x512xf32>
    %cst_11 = arith.constant 0.000000e+00 : f32
    %15 = vector.broadcast %cst_11 : f32 to vector<16x512xf32>
    %16 = arith.maximumf %14, %15 : vector<16x512xf32>
    %17 = arith.truncf %16 : vector<16x512xf32> to vector<16x512xbf16>
    %c0_12 = arith.constant 0 : index
    %c0_13 = arith.constant 0 : index
    %18 = vector.load %arg6[%c0_12, %c0_13] : memref<512x128xbf16, #tpu.memory_space<vmem>>, vector<512x128xbf16>
    %cst_14 = arith.constant dense<0.000000e+00> : vector<16x128xf32>
    %19 = tpu.matmul %17, %18, %cst_14 {dimension_numbers = #tpu.dot_dimension_numbers<[1], [0], [0], [1], [0, 0, 1, 1], [], []>} : vector<16x512xbf16>, vector<512x128xbf16>, vector<16x128xf32> -> vector<16x128xf32>
    %c0_15 = arith.constant 0 : index
    %c0_16 = arith.constant 0 : index
    %20 = vector.load %arg7[%c0_15, %c0_16] : memref<1x128xf32, #tpu.memory_space<vmem>>, vector<1x128xf32>
    %21 = vector.broadcast %20 : vector<1x128xf32> to vector<16x128xf32>
    %22 = arith.addf %19, %21 : vector<16x128xf32>
    %c0_17 = arith.constant 0 : index
    %c0_18 = arith.constant 0 : index
    %23 = vector.load %arg8[%c0_17, %c0_18] : memref<16x128xf32, #tpu.memory_space<vmem>>, vector<16x128xf32>
    tpu.vector_store %arg8[%c0_17, %c0_18], %22 {strides = array<i32>} : memref<16x128xf32, #tpu.memory_space<vmem>>, vector<16x128xf32>,
    return
  }
  func.func @transform_0(%arg0: i32) -> (i32, i32) {
    %c0_i32 = arith.constant 0 : i32
    %c0_i32_0 = arith.constant 0 : i32
    return %arg0, %c0_i32 : i32, i32
  }
  func.func @transform_1(%arg0: i32) -> (i32, i32) {
    %c0_i32 = arith.constant 0 : i32
    %c0_i32_0 = arith.constant 0 : i32
    %c0_i32_1 = arith.constant 0 : i32
    return %c0_i32, %c0_i32_0 : i32, i32
  }
  func.func @transform_2(%arg0: i32) -> (i32, i32) {
    %c0_i32 = arith.constant 0 : i32
    %c0_i32_0 = arith.constant 0 : i32
    %c0_i32_1 = arith.constant 0 : i32
    return %c0_i32, %c0_i32_0 : i32, i32
  }
  func.func @transform_3(%arg0: i32) -> (i32, i32) {
    %c0_i32 = arith.constant 0 : i32
    %c0_i32_0 = arith.constant 0 : i32
    %c0_i32_1 = arith.constant 0 : i32
    return %c0_i32, %c0_i32_0 : i32, i32
  }
  func.func @transform_4(%arg0: i32) -> (i32, i32) {
    %c0_i32 = arith.constant 0 : i32
    %c0_i32_0 = arith.constant 0 : i32
    %c0_i32_1 = arith.constant 0 : i32
    return %c0_i32, %c0_i32_0 : i32, i32
  }
  func.func @transform_5(%arg0: i32) -> (i32, i32) {
    %c0_i32 = arith.constant 0 : i32
    %c0_i32_0 = arith.constant 0 : i32
    %c0_i32_1 = arith.constant 0 : i32
    return %c0_i32, %c0_i32_0 : i32, i32
  }
  func.func @transform_6(%arg0: i32) -> (i32, i32) {
    %c0_i32 = arith.constant 0 : i32
    %c0_i32_0 = arith.constant 0 : i32
    %c0_i32_1 = arith.constant 0 : i32
    return %c0_i32, %c0_i32_0 : i32, i32
  }
  func.func @transform_7(%arg0: i32) -> (i32, i32) {
    %c0_i32 = arith.constant 0 : i32
    %c0_i32_0 = arith.constant 0 : i32
    return %arg0, %c0_i32 : i32, i32
  }
}

</mosaic_0001>

<bundles_post_ra>
// kernel: old_conv_neural_net_forward.1
= control target key start
LH: loop header
LB: loop body
LE: loop exit
PB: predicated region body
PF: predicated region fallthrough
CT: control target
= control target key end

     0   :  { %12 = vsyncpa [#allocation3], 0  ;;  %s4463_s0 = inlined_call_operand.vmem [shape: f32[16,896], index: 0, kind: input, shape index: {}]   ;;  %s4464_s1 = inlined_call_operand.hbm [shape: bf16[896,512], index: 1, kind: input, shape index: {}]   ;;  %s4465_s2 = inlined_call_operand.vmem [shape: f32[1,512], index: 2, kind: input, shape index: {}]   ;;  %s4466_s3 = inlined_call_operand.hbm [shape: bf16[512,512], index: 3, kind: input, shape index: {}]   ;;  %s4467_s4 = inlined_call_operand.vmem [shape: f32[1,512], index: 4, kind: input, shape index: {}]   ;;  %s4468_s5 = inlined_call_operand.vmem [shape: bf16[512,128], index: 5, kind: input, shape index: {}]   ;;  %s4469_s6 = inlined_call_operand.vmem [shape: f32[1,128], index: 6, kind: input, shape index: {}]   ;;  %s4470_s7 = inlined_call_operand.vmem [shape: f32[16,128], index: 7, kind: output, shape index: {}]  }
   0x1   :  { %13 = vsyncpa [#allocation5], 0  ;;  %s4215_s24 = smov [#allocation2]   ;;  %s4167_s28 = scalar_lea.hbm %s4464_s1, 28672 }
   0x2   :  { %s21_s25 = sshll.u32 %s4215_s24, 4  ;;  %p4168_p0 = scmp.ne.s32.totalorder %s4464_s1, %s4167_s28  ;;  %s22_s25 = int_to_ptr.vmem [resolvable:$true] %s21_s25 }
   0x3   :  { %p4171_p1 = scmp.lt.u32.totalorder %s4167_s28, %s4464_s1 }
   0x5   :  { %p4173_p2 = pnand %p4171_p1, %p4168_p0 }
   0x7   :  { %4176 = shalt.err (!%p4173_p2)
}
   0x8   :  { %s4177_s10 = scalar_lea.vmem %s22_s25, 28672  ;;  %p4182_p4 = scmp.lt.s32.totalorder %s22_s25, %s22_s25 }
   0x9   :  { %p4178_p3 = scmp.ne.s32.totalorder %s22_s25, %s4177_s10  ;;  %p4183_p5 = scmp.lt.s32.totalorder %s4177_s10, %s4177_s10 }
   0xb   :  { %p4184_p6 = por %p4183_p5, %p4182_p4 }
   0xd   :  { %p4185_p7 = pnand %p4184_p6, %p4178_p3 }
   0xf   :  { %4188 = shalt.err (!%p4185_p7)
}
  0x10   :  { %s4216_s11 = smov 256   ;;  %s4217_s12 = smov 16  }
  0x11   :  { %27 = dma.hbm_to_vmem [thread:$0]  %s4464_s1, 28672, %s22_s25, [#allocation3], %s4216_s11, %s4216_s11, %s4217_s12  }
  0x12   :  { %s4218_s15 = smov [#allocation4]   ;;  %s4189_s19 = scalar_lea.hbm %s4466_s3, 16384 }
  0x13   :  { %s35_s16 = sshll.u32 %s4218_s15, 4  ;;  %p4190_p8 = scmp.ne.s32.totalorder %s4466_s3, %s4189_s19  ;;  %s36_s16 = int_to_ptr.vmem [resolvable:$true] %s35_s16 }
  0x14   :  { %p4193_p9 = scmp.lt.u32.totalorder %s4189_s19, %s4466_s3 }
  0x16   :  { %p4195_p10 = pnand %p4193_p9, %p4190_p8 }
  0x18   :  { %4198 = shalt.err (!%p4195_p10)
}
  0x19   :  { %s4199_s24 = scalar_lea.vmem %s36_s16, 16384  ;;  %p4204_p12 = scmp.lt.s32.totalorder %s36_s16, %s36_s16 }
  0x1a   :  { %p4200_p11 = scmp.ne.s32.totalorder %s36_s16, %s4199_s24  ;;  %p4205_p13 = scmp.lt.s32.totalorder %s4199_s24, %s4199_s24 }
  0x1c   :  { %p4206_p0 = por %p4205_p13, %p4204_p12 }
  0x1e   :  { %p4207_p1 = pnand %p4206_p0, %p4200_p11 }
  0x20   :  { %4210 = shalt.err (!%p4207_p1)
}
  0x21   :  { %41 = dma.hbm_to_vmem [thread:$0]  %s4466_s3, 16384, %s36_s16, [#allocation5], %s4216_s11, %s4216_s11, %s4217_s12  }
  0x22   :  { %4211 = dma.done.wait [#allocation3], 28672  }
  0x23   :  { %4212 = vsyncadd [#allocation3], 4294938624 }
  0x24   :  { %4213 = dma.done.wait [#allocation5], 16384  }
  0x25   :  { %4214 = vsyncadd [#allocation5], 4294950912  ;;  %v3607_v0 = vld [vmem:[#allocation2 + $0x4] ss:$16 sps:$4 sm:$0xff]   ;;  %v3609_v1 = vld [vmem:[#allocation2 + $0xc] ss:$16 sps:$4 sm:$0xff]  }
  0x26   :  { %1442 = vmatprep.subr.bf16.mxu0 %v3607_v0  ;;  %v3611_v2 = vld [vmem:[#allocation2] ss:$16 sps:$4 sm:$0xff]   ;;  %v3612_v3 = vld [vmem:[#allocation2 + $0x8] ss:$16 sps:$4 sm:$0xff]   ;;  %1614 = vmatprep.subr.bf16.mxu1 %v3609_v1  ;;  %v3613_v4 = vld [vmem:[#allocation2 + $0x24] ss:$16 sps:$4 sm:$0xff]  }
  0x27   :  { %1443 = vmatpush1.bf16.msra.mxu0 %v3611_v2  ;;  %1615 = vmatpush1.bf16.msra.mxu1 %v3612_v3  ;;  %v3615_v5 = vld [vmem:[#allocation2 + $0x2c] ss:$16 sps:$4 sm:$0xff]   ;;  %v3617_v6 = vld [vmem:[#allocation2 + $0x20] ss:$16 sps:$4 sm:$0xff]   ;;  %v3618_v7 = vld [vmem:[#allocation2 + $0x28] ss:$16 sps:$4 sm:$0xff]  }
  0x28   :  { %1444 = vmatprep.subr.bf16.mxu0 %v3613_v4  ;;  %1616 = vmatprep.subr.bf16.mxu1 %v3615_v5  ;;  %v3619_v8 = vld [vmem:[#allocation2 + $0x44] ss:$16 sps:$4 sm:$0xff]   ;;  %v3621_v9 = vld [vmem:[#allocation2 + $0x4c] ss:$16 sps:$4 sm:$0xff]   ;;  %v3623_v10 = vld [vmem:[#allocation2 + $0x40] ss:$16 sps:$4 sm:$0xff]  }
  0x29   :  { %v3624_v11 = vld [vmem:[#allocation2 + $0x48] ss:$16 sps:$4 sm:$0xff]   ;;  %v3625_v12 = vld [vmem:[#allocation2 + $0x64] ss:$16 sps:$4 sm:$0xff]   ;;  %v3627_v13 = vld [vmem:[#allocation2 + $0x6c] ss:$16 sps:$4 sm:$0xff]  }
  0x2a   :  { %v3629_v14 = vld [vmem:[#allocation2 + $0x60] ss:$16 sps:$4 sm:$0xff]   ;;  %v3630_v15 = vld [vmem:[#allocation2 + $0x68] ss:$16 sps:$4 sm:$0xff]   ;;  %v3631_v16 = vld [vmem:[#allocation2 + $0x84] ss:$16 sps:$4 sm:$0xff]  }
  0x2b   :  { %1445 = vmatpush1.bf16.msra.mxu0 %v3617_v6  ;;  %1617 = vmatpush1.bf16.msra.mxu1 %v3618_v7  ;;  %v3633_v17 = vld [vmem:[#allocation2 + $0x8c] ss:$16 sps:$4 sm:$0xff]   ;;  %v3635_v18 = vld [vmem:[#allocation2 + $0x80] ss:$16 sps:$4 sm:$0xff]   ;;  %v3636_v19 = vld [vmem:[#allocation2 + $0x88] ss:$16 sps:$4 sm:$0xff]  }
  0x2c   :  { %1446 = vmatprep.subr.bf16.mxu0 %v3619_v8  ;;  %1618 = vmatprep.subr.bf16.mxu1 %v3621_v9  ;;  %v3637_v20 = vld [vmem:[#allocation2 + $0xa4] ss:$16 sps:$4 sm:$0xff]   ;;  %v3639_v21 = vld [vmem:[#allocation2 + $0xac] ss:$16 sps:$4 sm:$0xff]   ;;  %v3641_v22 = vld [vmem:[#allocation2 + $0xa0] ss:$16 sps:$4 sm:$0xff]  }
  0x2d   :  { %v3642_v23 = vld [vmem:[#allocation2 + $0xa8] ss:$16 sps:$4 sm:$0xff]   ;;  %v3643_v24 = vld [vmem:[#allocation2 + $0xc4] ss:$16 sps:$4 sm:$0xff]   ;;  %v3645_v25 = vld [vmem:[#allocation2 + $0xcc] ss:$16 sps:$4 sm:$0xff]  }
  0x2e   :  { %v3647_v26 = vld [vmem:[#allocation2 + $0xc0] ss:$16 sps:$4 sm:$0xff]   ;;  %v3648_v27 = vld [vmem:[#allocation2 + $0xc8] ss:$16 sps:$4 sm:$0xff]   ;;  %v3649_v28 = vld [vmem:[#allocation2 + $0xe4] ss:$16 sps:$4 sm:$0xff]  }
  0x2f   :  { %1447 = vmatpush1.bf16.msra.mxu0 %v3623_v10  ;;  %1619 = vmatpush1.bf16.msra.mxu1 %v3624_v11  ;;  %v3651_v29 = vld [vmem:[#allocation2 + $0xec] ss:$16 sps:$4 sm:$0xff]   ;;  %v3653_v30 = vld [vmem:[#allocation2 + $0xe0] ss:$16 sps:$4 sm:$0xff]   ;;  %v3654_v31 = vld [vmem:[#allocation2 + $0xe8] ss:$16 sps:$4 sm:$0xff]  }
  0x30   :  { %1448 = vmatprep.subr.bf16.mxu0 %v3625_v12  ;;  %1620 = vmatprep.subr.bf16.mxu1 %v3627_v13  ;;  %v3655_v32 = vld [vmem:[#allocation2 + $0x104] ss:$16 sps:$4 sm:$0xff]   ;;  %v3657_v33 = vld [vmem:[#allocation2 + $0x10c] ss:$16 sps:$4 sm:$0xff]   ;;  %v3659_v34 = vld [vmem:[#allocation2 + $0x100] ss:$16 sps:$4 sm:$0xff]  }
  0x31   :  { %v3660_v35 = vld [vmem:[#allocation2 + $0x108] ss:$16 sps:$4 sm:$0xff]   ;;  %v3661_v36 = vld [vmem:[#allocation2 + $0x124] ss:$16 sps:$4 sm:$0xff]   ;;  %v3663_v37 = vld [vmem:[#allocation2 + $0x12c] ss:$16 sps:$4 sm:$0xff]  }
  0x32   :  { %v3665_v38 = vld [vmem:[#allocation2 + $0x120] ss:$16 sps:$4 sm:$0xff]   ;;  %v3666_v39 = vld [vmem:[#allocation2 + $0x128] ss:$16 sps:$4 sm:$0xff]   ;;  %v3667_v40 = vld [vmem:[#allocation2 + $0x144] ss:$16 sps:$4 sm:$0xff]  }
  0x33   :  { %1449 = vmatpush1.bf16.msra.mxu0 %v3629_v14  ;;  %1621 = vmatpush1.bf16.msra.mxu1 %v3630_v15  ;;  %v3669_v41 = vld [vmem:[#allocation2 + $0x14c] ss:$16 sps:$4 sm:$0xff]   ;;  %v3671_v42 = vld [vmem:[#allocation2 + $0x140] ss:$16 sps:$4 sm:$0xff]   ;;  %v3672_v43 = vld [vmem:[#allocation2 + $0x148] ss:$16 sps:$4 sm:$0xff]  }
  0x34   :  { %1450 = vmatprep.subr.bf16.mxu0 %v3631_v16  ;;  %1622 = vmatprep.subr.bf16.mxu1 %v3633_v17  ;;  %v3673_v44 = vld [vmem:[#allocation2 + $0x164] ss:$16 sps:$4 sm:$0xff]   ;;  %v3675_v45 = vld [vmem:[#allocation2 + $0x16c] ss:$16 sps:$4 sm:$0xff]   ;;  %v3677_v48 = vld [vmem:[#allocation2 + $0x160] ss:$16 sps:$4 sm:$0xff]  }
  0x35   :  { %v56_v46 = vld [vmem:[%s4463_s0 + $0x8] sm:$0xff]  ;;  %v63_v47 = vld [vmem:[%s4463_s0 + $0x40] sm:$0xff]  ;;  %v62_v5 = vld [vmem:[%s4463_s0 + $0x38] sm:$0xff] }
  0x36   :  { %v3678_v49 = vld [vmem:[#allocation2 + $0x168] ss:$16 sps:$4 sm:$0xff]   ;;  %v70_v50 = vpack.c.bf16 %v63_v47, %v56_v46  ;;  %v3679_v51 = vld [vmem:[#allocation2 + $0x184] ss:$16 sps:$4 sm:$0xff]   ;;  %v3681_v52 = vld [vmem:[#allocation2 + $0x18c] ss:$16 sps:$4 sm:$0xff]  }
  0x37   :  { %1451 = vmatpush1.bf16.msra.mxu0 %v3635_v18  ;;  %1623 = vmatpush1.bf16.msra.mxu1 %v3636_v19  ;;  %v3683_v53 = vld [vmem:[#allocation2 + $0x180] ss:$16 sps:$4 sm:$0xff]   ;;  %v3684_v54 = vld [vmem:[#allocation2 + $0x188] ss:$16 sps:$4 sm:$0xff]   ;;  %v3685_v55 = vld [vmem:[#allocation2 + $0x1a4] ss:$16 sps:$4 sm:$0xff]  }
  0x38   :  { %1452 = vmatprep.subr.bf16.mxu0 %v3637_v20  ;;  %1624 = vmatprep.subr.bf16.mxu1 %v3639_v21  ;;  %v3687_v56 = vld [vmem:[#allocation2 + $0x1ac] ss:$16 sps:$4 sm:$0xff]   ;;  %v3689_v57 = vld [vmem:[#allocation2 + $0x1a0] ss:$16 sps:$4 sm:$0xff]   ;;  %v3690_v58 = vld [vmem:[#allocation2 + $0x1a8] ss:$16 sps:$4 sm:$0xff]  }
  0x39   :  { %1474 = vmatprep.mubr.bf16.mxu0 %v70_v50  ;;  %1646 = vmatprep.mubr.bf16.mxu1 %v70_v50  ;;  %v3691_v59 = vld [vmem:[#allocation2 + $0x1c4] ss:$16 sps:$4 sm:$0xff]   ;;  %v3693_v60 = vld [vmem:[#allocation2 + $0x1cc] ss:$16 sps:$4 sm:$0xff]   ;;  %v3695_v61 = vld [vmem:[#allocation2 + $0x1c0] ss:$16 sps:$4 sm:$0xff]  }
  0x3a   :  { %v3696_v62 = vld [vmem:[#allocation2 + $0x1c8] ss:$16 sps:$4 sm:$0xff]   ;;  %v3697_v63 = vld [vmem:[#allocation2 + $0x1e4] ss:$16 sps:$4 sm:$0xff]   ;;  %v3699_v0 = vld [vmem:[#allocation2 + $0x1ec] ss:$16 sps:$4 sm:$0xff]  }
  0x3b   :  { %1453 = vmatpush1.bf16.msra.mxu0 %v3641_v22  ;;  %1625 = vmatpush1.bf16.msra.mxu1 %v3642_v23  ;;  %v3701_v1 = vld [vmem:[#allocation2 + $0x1e0] ss:$16 sps:$4 sm:$0xff]   ;;  %v3702_v2 = vld [vmem:[#allocation2 + $0x1e8] ss:$16 sps:$4 sm:$0xff]   ;;  %v3705_v3 = vld [vmem:[#allocation2 + $0x204] ss:$16 sps:$4 sm:$0xff]  }
  0x3c   :  { %1454 = vmatprep.subr.bf16.mxu0 %v3643_v24  ;;  %1626 = vmatprep.subr.bf16.mxu1 %v3645_v25  ;;  %v55_v4 = vld [vmem:[%s4463_s0] sm:$0xff]  ;;  %v3708_v6 = vld [vmem:[#allocation2 + $0x20c] ss:$16 sps:$4 sm:$0xff]   ;;  %v3706_v8 = vld [vmem:[#allocation2 + $0x208] ss:$16 sps:$4 sm:$0xff]  }
  0x3d   :  { %v3703_v7 = vld [vmem:[#allocation2 + $0x200] ss:$16 sps:$4 sm:$0xff]   ;;  %v69_v9 = vpack.c.bf16 %v62_v5, %v55_v4  ;;  %v3711_v10 = vld [vmem:[#allocation2 + $0x224] ss:$16 sps:$4 sm:$0xff]   ;;  %v3714_v11 = vld [vmem:[#allocation2 + $0x22c] ss:$16 sps:$4 sm:$0xff]  }
  0x3e   :  { %v3709_v12 = vld [vmem:[#allocation2 + $0x220] ss:$16 sps:$4 sm:$0xff]   ;;  %v3712_v13 = vld [vmem:[#allocation2 + $0x228] ss:$16 sps:$4 sm:$0xff]   ;;  %v3717_v14 = vld [vmem:[#allocation2 + $0x244] ss:$16 sps:$4 sm:$0xff]  }
  0x3f   :  { %1455 = vmatpush1.bf16.msra.mxu0 %v3647_v26  ;;  %1627 = vmatpush1.bf16.msra.mxu1 %v3648_v27  ;;  %v3720_v15 = vld [vmem:[#allocation2 + $0x24c] ss:$16 sps:$4 sm:$0xff]   ;;  %v3715_v16 = vld [vmem:[#allocation2 + $0x240] ss:$16 sps:$4 sm:$0xff]   ;;  %v3718_v17 = vld [vmem:[#allocation2 + $0x248] ss:$16 sps:$4 sm:$0xff]  }
  0x40   :  { %1456 = vmatprep.subr.bf16.mxu0 %v3649_v28  ;;  %1628 = vmatprep.subr.bf16.mxu1 %v3651_v29  ;;  %v3723_v18 = vld [vmem:[#allocation2 + $0x264] ss:$16 sps:$4 sm:$0xff]   ;;  %v3726_v19 = vld [vmem:[#allocation2 + $0x26c] ss:$16 sps:$4 sm:$0xff]   ;;  %v3721_v20 = vld [vmem:[#allocation2 + $0x260] ss:$16 sps:$4 sm:$0xff]  }
  0x41   :  { %v3724_v21 = vld [vmem:[#allocation2 + $0x268] ss:$16 sps:$4 sm:$0xff]   ;;  %v3729_v22 = vld [vmem:[#allocation2 + $0x284] ss:$16 sps:$4 sm:$0xff]   ;;  %v3732_v23 = vld [vmem:[#allocation2 + $0x28c] ss:$16 sps:$4 sm:$0xff]  }
  0x42   :  { %v3727_v24 = vld [vmem:[#allocation2 + $0x280] ss:$16 sps:$4 sm:$0xff]   ;;  %v3730_v25 = vld [vmem:[#allocation2 + $0x288] ss:$16 sps:$4 sm:$0xff]   ;;  %v3735_v26 = vld [vmem:[#allocation2 + $0x2a4] ss:$16 sps:$4 sm:$0xff]  }
  0x43   :  { %1457 = vmatpush1.bf16.msra.mxu0 %v3653_v30  ;;  %1629 = vmatpush1.bf16.msra.mxu1 %v3654_v31  ;;  %v3738_v27 = vld [vmem:[#allocation2 + $0x2ac] ss:$16 sps:$4 sm:$0xff]   ;;  %v3733_v28 = vld [vmem:[#allocation2 + $0x2a0] ss:$16 sps:$4 sm:$0xff]   ;;  %v3736_v29 = vld [vmem:[#allocation2 + $0x2a8] ss:$16 sps:$4 sm:$0xff]  }
  0x44   :  { %1458 = vmatprep.subr.bf16.mxu0 %v3655_v32  ;;  %1630 = vmatprep.subr.bf16.mxu1 %v3657_v33  ;;  %v3741_v30 = vld [vmem:[#allocation2 + $0x2c4] ss:$16 sps:$4 sm:$0xff]   ;;  %v3744_v31 = vld [vmem:[#allocation2 + $0x2cc] ss:$16 sps:$4 sm:$0xff]   ;;  %v3757_v47 = vld [vmem:[#allocation2 + $0x320] ss:$16 sps:$4 sm:$0xff]  }
  0x45   :  { %v58_v32 = vld [vmem:[%s4463_s0 + $0x18] sm:$0xff]  ;;  %v65_v33 = vld [vmem:[%s4463_s0 + $0x50] sm:$0xff] }
  0x46   :  { %v3762_v46 = vld [vmem:[#allocation2 + $0x32c] ss:$16 sps:$4 sm:$0xff]   ;;  %v3790_v4 = vld [vmem:[#allocation2 + $0x3c8] ss:$16 sps:$4 sm:$0xff]   ;;  %v3795_v5 = vld [vmem:[#allocation2 + $0x3e4] ss:$16 sps:$4 sm:$0xff]  }
  0x47   :  { %1459 = vmatpush1.bf16.msra.mxu0 %v3659_v34  ;;  %1631 = vmatpush1.bf16.msra.mxu1 %v3660_v35  ;;  %v3739_v34 = vld [vmem:[#allocation2 + $0x2c0] ss:$16 sps:$4 sm:$0xff]   ;;  %v3742_v35 = vld [vmem:[#allocation2 + $0x2c8] ss:$16 sps:$4 sm:$0xff]   ;;  %v3768_v50 = vld [vmem:[#allocation2 + $0x34c] ss:$16 sps:$4 sm:$0xff]  }
  0x48   :  { %1460 = vmatprep.subr.bf16.mxu0 %v3661_v36  ;;  %1632 = vmatprep.subr.bf16.mxu1 %v3663_v37  ;;  %v72_v36 = vpack.c.bf16 %v65_v33, %v58_v32  ;;  %v3747_v37 = vld [vmem:[#allocation2 + $0x2e4] ss:$16 sps:$4 sm:$0xff]   ;;  %v3828_v32 = vld [vmem:[#allocation2 + $0x48c] ss:$16 sps:$4 sm:$0xff]   ;;  %v3823_v33 = vld [vmem:[#allocation2 + $0x480] ss:$16 sps:$4 sm:$0xff]  }
  0x4b   :  { %1461 = vmatpush1.bf16.msra.mxu0 %v3665_v38  ;;  %1633 = vmatpush1.bf16.msra.mxu1 %v3666_v39  ;;  %v3750_v38 = vld [vmem:[#allocation2 + $0x2ec] ss:$16 sps:$4 sm:$0xff]   ;;  %v3745_v39 = vld [vmem:[#allocation2 + $0x2e0] ss:$16 sps:$4 sm:$0xff]  }
  0x4c   :  { %1462 = vmatprep.subr.bf16.mxu0 %v3667_v40  ;;  %1634 = vmatprep.subr.bf16.mxu1 %v3669_v41  ;;  %v3748_v40 = vld [vmem:[#allocation2 + $0x2e8] ss:$16 sps:$4 sm:$0xff]   ;;  %v3753_v41 = vld [vmem:[#allocation2 + $0x304] ss:$16 sps:$4 sm:$0xff]  }
  0x4f   :  { %1463 = vmatpush1.bf16.msra.mxu0 %v3671_v42  ;;  %1635 = vmatpush1.bf16.msra.mxu1 %v3672_v43  ;;  %v3756_v42 = vld [vmem:[#allocation2 + $0x30c] ss:$16 sps:$4 sm:$0xff]   ;;  %v3751_v43 = vld [vmem:[#allocation2 + $0x300] ss:$16 sps:$4 sm:$0xff]  }
  0x50   :  { %1464 = vmatprep.subr.bf16.mxu0 %v3673_v44  ;;  %1636 = vmatprep.subr.bf16.mxu1 %v3675_v45  ;;  %v3754_v44 = vld [vmem:[#allocation2 + $0x308] ss:$16 sps:$4 sm:$0xff]   ;;  %v3759_v45 = vld [vmem:[#allocation2 + $0x324] ss:$16 sps:$4 sm:$0xff]  }
  0x53   :  { %1465 = vmatpush1.bf16.msra.mxu0 %v3677_v48  ;;  %1637 = vmatpush1.bf16.msra.mxu1 %v3678_v49  ;;  %v3760_v48 = vld [vmem:[#allocation2 + $0x328] ss:$16 sps:$4 sm:$0xff]   ;;  %v3765_v49 = vld [vmem:[#allocation2 + $0x344] ss:$16 sps:$4 sm:$0xff]  }
  0x54   :  { %1466 = vmatprep.subr.bf16.mxu0 %v3679_v51  ;;  %1638 = vmatprep.subr.bf16.mxu1 %v3681_v52  ;;  %v3763_v51 = vld [vmem:[#allocation2 + $0x340] ss:$16 sps:$4 sm:$0xff]   ;;  %v3766_v52 = vld [vmem:[#allocation2 + $0x348] ss:$16 sps:$4 sm:$0xff]  }
  0x57   :  { %1467 = vmatpush1.bf16.msra.mxu0 %v3683_v53  ;;  %1639 = vmatpush1.bf16.msra.mxu1 %v3684_v54  ;;  %v3771_v53 = vld [vmem:[#allocation2 + $0x364] ss:$16 sps:$4 sm:$0xff]   ;;  %v3774_v54 = vld [vmem:[#allocation2 + $0x36c] ss:$16 sps:$4 sm:$0xff]  }
  0x58   :  { %1468 = vmatprep.subr.bf16.mxu0 %v3685_v55  ;;  %1640 = vmatprep.subr.bf16.mxu1 %v3687_v56  ;;  %v3769_v55 = vld [vmem:[#allocation2 + $0x360] ss:$16 sps:$4 sm:$0xff]   ;;  %v3772_v56 = vld [vmem:[#allocation2 + $0x368] ss:$16 sps:$4 sm:$0xff]  }
  0x5b   :  { %1469 = vmatpush1.bf16.msra.mxu0 %v3689_v57  ;;  %1641 = vmatpush1.bf16.msra.mxu1 %v3690_v58  ;;  %v3777_v57 = vld [vmem:[#allocation2 + $0x384] ss:$16 sps:$4 sm:$0xff]   ;;  %v3780_v58 = vld [vmem:[#allocation2 + $0x38c] ss:$16 sps:$4 sm:$0xff]  }
  0x5c   :  { %1470 = vmatprep.subr.bf16.mxu0 %v3691_v59  ;;  %1642 = vmatprep.subr.bf16.mxu1 %v3693_v60  ;;  %v3775_v59 = vld [vmem:[#allocation2 + $0x380] ss:$16 sps:$4 sm:$0xff]   ;;  %v3778_v60 = vld [vmem:[#allocation2 + $0x388] ss:$16 sps:$4 sm:$0xff]  }
  0x5f   :  { %1471 = vmatpush1.bf16.msra.mxu0 %v3695_v61  ;;  %1643 = vmatpush1.bf16.msra.mxu1 %v3696_v62  ;;  %v3783_v61 = vld [vmem:[#allocation2 + $0x3a4] ss:$16 sps:$4 sm:$0xff]   ;;  %v3786_v62 = vld [vmem:[#allocation2 + $0x3ac] ss:$16 sps:$4 sm:$0xff]  }
  0x60   :  { %1472 = vmatprep.subr.bf16.mxu0 %v3697_v63  ;;  %1644 = vmatprep.subr.bf16.mxu1 %v3699_v0  ;;  %v3781_v63 = vld [vmem:[#allocation2 + $0x3a0] ss:$16 sps:$4 sm:$0xff]   ;;  %v3784_v0 = vld [vmem:[#allocation2 + $0x3a8] ss:$16 sps:$4 sm:$0xff]  }
  0x63   :  { %1473 = vmatpush1.bf16.msra.mxu0 %v3701_v1  ;;  %1645 = vmatpush1.bf16.msra.mxu1 %v3702_v2  ;;  %v3789_v1 = vld [vmem:[#allocation2 + $0x3c4] ss:$16 sps:$4 sm:$0xff]   ;;  %v3792_v2 = vld [vmem:[#allocation2 + $0x3cc] ss:$16 sps:$4 sm:$0xff]  }
  0x64   :  { %1485 = vmatprep.subr.bf16.mxu0 %v3705_v3  ;;  %1657 = vmatprep.subr.bf16.mxu1 %v3708_v6  ;;  %v3787_v3 = vld [vmem:[#allocation2 + $0x3c0] ss:$16 sps:$4 sm:$0xff]   ;;  %v3798_v6 = vld [vmem:[#allocation2 + $0x3ec] ss:$16 sps:$4 sm:$0xff]  }
  0x66   :  { %1475 = vmatmul.mubr.bf16.vlgmr.msra.gmra.mrb[0].mxu0 %v69_v9  ;;  %1647 = vmatmul.mubr.bf16.vlgmr.msra.gmra.mrb[0].mxu1 %v69_v9  ;;  %v3801_v9 = vld [vmem:[#allocation2 + $0x404] ss:$16 sps:$4 sm:$0xff]  }
  0x67   :  { %1486 = vmatpush1.bf16.msra.mxu0 %v3703_v7  ;;  %1658 = vmatpush1.bf16.msra.mxu1 %v3706_v8  ;;  %v3793_v7 = vld [vmem:[#allocation2 + $0x3e0] ss:$16 sps:$4 sm:$0xff]   ;;  %v3796_v8 = vld [vmem:[#allocation2 + $0x3e8] ss:$16 sps:$4 sm:$0xff]  }
  0x68   :  { %1487 = vmatprep.subr.bf16.mxu0 %v3711_v10  ;;  %1659 = vmatprep.subr.bf16.mxu1 %v3714_v11  ;;  %v57_v10 = vld [vmem:[%s4463_s0 + $0x10] sm:$0xff]  ;;  %v64_v11 = vld [vmem:[%s4463_s0 + $0x48] sm:$0xff] }
  0x69   :  { %1517 = vmatprep.mubr.bf16.mxu0 %v72_v36  ;;  %1689 = vmatprep.mubr.bf16.mxu1 %v72_v36  ;;  %v3834_v36 = vld [vmem:[#allocation2 + $0x4ac] ss:$16 sps:$4 sm:$0xff]  }
  0x6b   :  { %1488 = vmatpush1.bf16.msra.mxu0 %v3709_v12  ;;  %1660 = vmatpush1.bf16.msra.mxu1 %v3712_v13  ;;  %v3804_v12 = vld [vmem:[#allocation2 + $0x40c] ss:$16 sps:$4 sm:$0xff]   ;;  %v3799_v13 = vld [vmem:[#allocation2 + $0x400] ss:$16 sps:$4 sm:$0xff]  }
  0x6c   :  { %1489 = vmatprep.subr.bf16.mxu0 %v3717_v14  ;;  %1661 = vmatprep.subr.bf16.mxu1 %v3720_v15  ;;  %v3802_v14 = vld [vmem:[#allocation2 + $0x408] ss:$16 sps:$4 sm:$0xff]   ;;  %v71_v15 = vpack.c.bf16 %v64_v11, %v57_v10  ;;  %v3891_v11 = vld [vmem:[#allocation2 + $0x5e4] ss:$16 sps:$4 sm:$0xff]  }
  0x6d   :  { %v3886_v10 = vld [vmem:[#allocation2 + $0x5c8] ss:$16 sps:$4 sm:$0xff]  }
  0x6f   :  { %1490 = vmatpush1.bf16.msra.mxu0 %v3715_v16  ;;  %1662 = vmatpush1.bf16.msra.mxu1 %v3718_v17  ;;  %v3807_v16 = vld [vmem:[#allocation2 + $0x424] ss:$16 sps:$4 sm:$0xff]   ;;  %v3810_v17 = vld [vmem:[#allocation2 + $0x42c] ss:$16 sps:$4 sm:$0xff]  }
  0x70   :  { %1491 = vmatprep.subr.bf16.mxu0 %v3723_v18  ;;  %1663 = vmatprep.subr.bf16.mxu1 %v3726_v19  ;;  %v60_v18 = vld [vmem:[%s4463_s0 + $0x28] sm:$0xff]  ;;  %v67_v19 = vld [vmem:[%s4463_s0 + $0x60] sm:$0xff] }
  0x73   :  { %1492 = vmatpush1.bf16.msra.mxu0 %v3721_v20  ;;  %1664 = vmatpush1.bf16.msra.mxu1 %v3724_v21  ;;  %v3805_v20 = vld [vmem:[#allocation2 + $0x420] ss:$16 sps:$4 sm:$0xff]   ;;  %v3808_v21 = vld [vmem:[#allocation2 + $0x428] ss:$16 sps:$4 sm:$0xff]  }
  0x74   :  { %1493 = vmatprep.subr.bf16.mxu0 %v3729_v22  ;;  %1665 = vmatprep.subr.bf16.mxu1 %v3732_v23  ;;  %v74_v22 = vpack.c.bf16 %v67_v19, %v60_v18  ;;  %v3813_v23 = vld [vmem:[#allocation2 + $0x444] ss:$16 sps:$4 sm:$0xff]   ;;  %v3900_v18 = vld [vmem:[#allocation2 + $0x60c] ss:$16 sps:$4 sm:$0xff]   ;;  %v3895_v19 = vld [vmem:[#allocation2 + $0x600] ss:$16 sps:$4 sm:$0xff]  }
  0x77   :  { %1494 = vmatpush1.bf16.msra.mxu0 %v3727_v24  ;;  %1666 = vmatpush1.bf16.msra.mxu1 %v3730_v25  ;;  %v3816_v24 = vld [vmem:[#allocation2 + $0x44c] ss:$16 sps:$4 sm:$0xff]   ;;  %v3811_v25 = vld [vmem:[#allocation2 + $0x440] ss:$16 sps:$4 sm:$0xff]  }
  0x78   :  { %1495 = vmatprep.subr.bf16.mxu0 %v3735_v26  ;;  %1667 = vmatprep.subr.bf16.mxu1 %v3738_v27  ;;  %v3814_v26 = vld [vmem:[#allocation2 + $0x448] ss:$16 sps:$4 sm:$0xff]   ;;  %v3819_v27 = vld [vmem:[#allocation2 + $0x464] ss:$16 sps:$4 sm:$0xff]  }
  0x7b   :  { %1496 = vmatpush1.bf16.msra.mxu0 %v3733_v28  ;;  %1668 = vmatpush1.bf16.msra.mxu1 %v3736_v29  ;;  %v3822_v28 = vld [vmem:[#allocation2 + $0x46c] ss:$16 sps:$4 sm:$0xff]   ;;  %v3817_v29 = vld [vmem:[#allocation2 + $0x460] ss:$16 sps:$4 sm:$0xff]  }
  0x7c   :  { %1497 = vmatprep.subr.bf16.mxu0 %v3741_v30  ;;  %1669 = vmatprep.subr.bf16.mxu1 %v3744_v31  ;;  %v3820_v30 = vld [vmem:[#allocation2 + $0x468] ss:$16 sps:$4 sm:$0xff]   ;;  %v3825_v31 = vld [vmem:[#allocation2 + $0x484] ss:$16 sps:$4 sm:$0xff]  }
  0x7f   :  { %1498 = vmatpush1.bf16.msra.mxu0 %v3739_v34  ;;  %1670 = vmatpush1.bf16.msra.mxu1 %v3742_v35  ;;  %v3826_v34 = vld [vmem:[#allocation2 + $0x488] ss:$16 sps:$4 sm:$0xff]   ;;  %v3831_v35 = vld [vmem:[#allocation2 + $0x4a4] ss:$16 sps:$4 sm:$0xff]  }
  0x80   :  { %1499 = vmatprep.subr.bf16.mxu0 %v3747_v37  ;;  %1671 = vmatprep.subr.bf16.mxu1 %v3750_v38  ;;  %v3829_v37 = vld [vmem:[#allocation2 + $0x4a0] ss:$16 sps:$4 sm:$0xff]   ;;  %v3832_v38 = vld [vmem:[#allocation2 + $0x4a8] ss:$16 sps:$4 sm:$0xff]  }
  0x83   :  { %1500 = vmatpush1.bf16.msra.mxu0 %v3745_v39  ;;  %1672 = vmatpush1.bf16.msra.mxu1 %v3748_v40  ;;  %v3837_v39 = vld [vmem:[#allocation2 + $0x4c4] ss:$16 sps:$4 sm:$0xff]   ;;  %v3840_v40 = vld [vmem:[#allocation2 + $0x4cc] ss:$16 sps:$4 sm:$0xff]  }
  0x84   :  { %1501 = vmatprep.subr.bf16.mxu0 %v3753_v41  ;;  %1673 = vmatprep.subr.bf16.mxu1 %v3756_v42  ;;  %v3835_v41 = vld [vmem:[#allocation2 + $0x4c0] ss:$16 sps:$4 sm:$0xff]   ;;  %v3838_v42 = vld [vmem:[#allocation2 + $0x4c8] ss:$16 sps:$4 sm:$0xff]  }
  0x87   :  { %1502 = vmatpush1.bf16.msra.mxu0 %v3751_v43  ;;  %1674 = vmatpush1.bf16.msra.mxu1 %v3754_v44  ;;  %v3843_v43 = vld [vmem:[#allocation2 + $0x4e4] ss:$16 sps:$4 sm:$0xff]   ;;  %v3846_v44 = vld [vmem:[#allocation2 + $0x4ec] ss:$16 sps:$4 sm:$0xff]  }
  0x88   :  { %1503 = vmatprep.subr.bf16.mxu0 %v3759_v45  ;;  %1675 = vmatprep.subr.bf16.mxu1 %v3762_v46  ;;  %v3841_v45 = vld [vmem:[#allocation2 + $0x4e0] ss:$16 sps:$4 sm:$0xff]   ;;  %v3844_v46 = vld [vmem:[#allocation2 + $0x4e8] ss:$16 sps:$4 sm:$0xff]  }
  0x8b   :  { %1504 = vmatpush1.bf16.msra.mxu0 %v3757_v47  ;;  %1676 = vmatpush1.bf16.msra.mxu1 %v3760_v48  ;;  %v3849_v47 = vld [vmem:[#allocation2 + $0x504] ss:$16 sps:$4 sm:$0xff]   ;;  %v3852_v48 = vld [vmem:[#allocation2 + $0x50c] ss:$16 sps:$4 sm:$0xff]  }
  0x8c   :  { %1505 = vmatprep.subr.bf16.mxu0 %v3765_v49  ;;  %1677 = vmatprep.subr.bf16.mxu1 %v3768_v50  ;;  %v3847_v49 = vld [vmem:[#allocation2 + $0x500] ss:$16 sps:$4 sm:$0xff]   ;;  %v3850_v50 = vld [vmem:[#allocation2 + $0x508] ss:$16 sps:$4 sm:$0xff]  }
  0x8f   :  { %1506 = vmatpush1.bf16.msra.mxu0 %v3763_v51  ;;  %1678 = vmatpush1.bf16.msra.mxu1 %v3766_v52  ;;  %v3855_v51 = vld [vmem:[#allocation2 + $0x524] ss:$16 sps:$4 sm:$0xff]   ;;  %v3858_v52 = vld [vmem:[#allocation2 + $0x52c] ss:$16 sps:$4 sm:$0xff]  }
  0x90   :  { %1507 = vmatprep.subr.bf16.mxu0 %v3771_v53  ;;  %1679 = vmatprep.subr.bf16.mxu1 %v3774_v54  ;;  %v3853_v53 = vld [vmem:[#allocation2 + $0x520] ss:$16 sps:$4 sm:$0xff]   ;;  %v3856_v54 = vld [vmem:[#allocation2 + $0x528] ss:$16 sps:$4 sm:$0xff]  }
  0x93   :  { %1508 = vmatpush1.bf16.msra.mxu0 %v3769_v55  ;;  %1680 = vmatpush1.bf16.msra.mxu1 %v3772_v56  ;;  %v3861_v55 = vld [vmem:[#allocation2 + $0x544] ss:$16 sps:$4 sm:$0xff]   ;;  %v3864_v56 = vld [vmem:[#allocation2 + $0x54c] ss:$16 sps:$4 sm:$0xff]  }
  0x94   :  { %1509 = vmatprep.subr.bf16.mxu0 %v3777_v57  ;;  %1681 = vmatprep.subr.bf16.mxu1 %v3780_v58  ;;  %v3859_v57 = vld [vmem:[#allocation2 + $0x540] ss:$16 sps:$4 sm:$0xff]   ;;  %v3862_v58 = vld [vmem:[#allocation2 + $0x548] ss:$16 sps:$4 sm:$0xff]  }
  0x97   :  { %1510 = vmatpush1.bf16.msra.mxu0 %v3775_v59  ;;  %1682 = vmatpush1.bf16.msra.mxu1 %v3778_v60  ;;  %v3867_v59 = vld [vmem:[#allocation2 + $0x564] ss:$16 sps:$4 sm:$0xff]   ;;  %v3870_v60 = vld [vmem:[#allocation2 + $0x56c] ss:$16 sps:$4 sm:$0xff]  }
  0x98   :  { %1511 = vmatprep.subr.bf16.mxu0 %v3783_v61  ;;  %1683 = vmatprep.subr.bf16.mxu1 %v3786_v62  ;;  %v3865_v61 = vld [vmem:[#allocation2 + $0x560] ss:$16 sps:$4 sm:$0xff]   ;;  %v3868_v62 = vld [vmem:[#allocation2 + $0x568] ss:$16 sps:$4 sm:$0xff]  }
  0x9b   :  { %1512 = vmatpush1.bf16.msra.mxu0 %v3781_v63  ;;  %1684 = vmatpush1.bf16.msra.mxu1 %v3784_v0  ;;  %v3873_v63 = vld [vmem:[#allocation2 + $0x584] ss:$16 sps:$4 sm:$0xff]   ;;  %v3876_v0 = vld [vmem:[#allocation2 + $0x58c] ss:$16 sps:$4 sm:$0xff]  }
  0x9c   :  { %1513 = vmatprep.subr.bf16.mxu0 %v3789_v1  ;;  %1685 = vmatprep.subr.bf16.mxu1 %v3792_v2  ;;  %v3871_v1 = vld [vmem:[#allocation2 + $0x580] ss:$16 sps:$4 sm:$0xff]   ;;  %v3874_v2 = vld [vmem:[#allocation2 + $0x588] ss:$16 sps:$4 sm:$0xff]  }
  0x9f   :  { %1514 = vmatpush1.bf16.msra.mxu0 %v3787_v3  ;;  %1686 = vmatpush1.bf16.msra.mxu1 %v3790_v4  ;;  %v3879_v3 = vld [vmem:[#allocation2 + $0x5a4] ss:$16 sps:$4 sm:$0xff]   ;;  %v3882_v4 = vld [vmem:[#allocation2 + $0x5ac] ss:$16 sps:$4 sm:$0xff]  }
  0xa0   :  { %1515 = vmatprep.subr.bf16.mxu0 %v3795_v5  ;;  %1687 = vmatprep.subr.bf16.mxu1 %v3798_v6  ;;  %v3877_v5 = vld [vmem:[#allocation2 + $0x5a0] ss:$16 sps:$4 sm:$0xff]   ;;  %v3880_v6 = vld [vmem:[#allocation2 + $0x5a8] ss:$16 sps:$4 sm:$0xff]  }
  0xa3   :  { %1516 = vmatpush1.bf16.msra.mxu0 %v3793_v7  ;;  %1688 = vmatpush1.bf16.msra.mxu1 %v3796_v8  ;;  %v3885_v7 = vld [vmem:[#allocation2 + $0x5c4] ss:$16 sps:$4 sm:$0xff]   ;;  %v3888_v8 = vld [vmem:[#allocation2 + $0x5cc] ss:$16 sps:$4 sm:$0xff]  }
  0xa4   :  { %1528 = vmatprep.subr.bf16.mxu0 %v3801_v9  ;;  %1700 = vmatprep.subr.bf16.mxu1 %v3804_v12  ;;  %v3883_v9 = vld [vmem:[#allocation2 + $0x5c0] ss:$16 sps:$4 sm:$0xff]   ;;  %v3894_v12 = vld [vmem:[#allocation2 + $0x5ec] ss:$16 sps:$4 sm:$0xff]  }
  0xa6   :  { %1518 = vmatmul.mubr.bf16.vlgmr.msra.gmra.mrb[0].mxu0 %v71_v15  ;;  %1690 = vmatmul.mubr.bf16.vlgmr.msra.gmra.mrb[0].mxu1 %v71_v15  ;;  %v59_v15 = vld [vmem:[%s4463_s0 + $0x20] sm:$0xff] }
  0xa7   :  { %1529 = vmatpush1.bf16.msra.mxu0 %v3799_v13  ;;  %1701 = vmatpush1.bf16.msra.mxu1 %v3802_v14  ;;  %v3889_v13 = vld [vmem:[#allocation2 + $0x5e0] ss:$16 sps:$4 sm:$0xff]   ;;  %v3892_v14 = vld [vmem:[#allocation2 + $0x5e8] ss:$16 sps:$4 sm:$0xff]  }
  0xa8   :  { %1530 = vmatprep.subr.bf16.mxu0 %v3807_v16  ;;  %1702 = vmatprep.subr.bf16.mxu1 %v3810_v17  ;;  %v66_v16 = vld [vmem:[%s4463_s0 + $0x58] sm:$0xff]  ;;  %v3897_v17 = vld [vmem:[#allocation2 + $0x604] ss:$16 sps:$4 sm:$0xff]  }
  0xa9   :  { %1560 = vmatprep.mubr.bf16.mxu0 %v74_v22  ;;  %1732 = vmatprep.mubr.bf16.mxu1 %v74_v22  ;;  %v3903_v22 = vld [vmem:[#allocation2 + $0x624] ss:$16 sps:$4 sm:$0xff]  }
  0xab   :  { %1531 = vmatpush1.bf16.msra.mxu0 %v3805_v20  ;;  %1703 = vmatpush1.bf16.msra.mxu1 %v3808_v21  ;;  %v3898_v20 = vld [vmem:[#allocation2 + $0x608] ss:$16 sps:$4 sm:$0xff]   ;;  %v73_v21 = vpack.c.bf16 %v66_v16, %v59_v15  ;;  %v3984_v15 = vld [vmem:[#allocation4 + $0xcc] ss:$16 sps:$4 sm:$0xff]   ;;  %v3979_v16 = vld [vmem:[#allocation4 + $0xc0] ss:$16 sps:$4 sm:$0xff]  }
  0xac   :  { %1532 = vmatprep.subr.bf16.mxu0 %v3813_v23  ;;  %1704 = vmatprep.subr.bf16.mxu1 %v3816_v24  ;;  %v3906_v23 = vld [vmem:[#allocation2 + $0x62c] ss:$16 sps:$4 sm:$0xff]   ;;  %v3901_v24 = vld [vmem:[#allocation2 + $0x620] ss:$16 sps:$4 sm:$0xff]  }
  0xaf   :  { %1533 = vmatpush1.bf16.msra.mxu0 %v3811_v25  ;;  %1705 = vmatpush1.bf16.msra.mxu1 %v3814_v26  ;;  %v3904_v25 = vld [vmem:[#allocation2 + $0x628] ss:$16 sps:$4 sm:$0xff]   ;;  %v3909_v26 = vld [vmem:[#allocation2 + $0x644] ss:$16 sps:$4 sm:$0xff]  }
  0xb0   :  { %1534 = vmatprep.subr.bf16.mxu0 %v3819_v27  ;;  %1706 = vmatprep.subr.bf16.mxu1 %v3822_v28  ;;  %v3912_v27 = vld [vmem:[#allocation2 + $0x64c] ss:$16 sps:$4 sm:$0xff]   ;;  %v3907_v28 = vld [vmem:[#allocation2 + $0x640] ss:$16 sps:$4 sm:$0xff]  }
  0xb3   :  { %1535 = vmatpush1.bf16.msra.mxu0 %v3817_v29  ;;  %1707 = vmatpush1.bf16.msra.mxu1 %v3820_v30  ;;  %v3910_v29 = vld [vmem:[#allocation2 + $0x648] ss:$16 sps:$4 sm:$0xff]   ;;  %v4219_v30 = vmov 0  }
  0xb4   :  { %1536 = vmatprep.subr.bf16.mxu0 %v3825_v31  ;;  %1708 = vmatprep.subr.bf16.mxu1 %v3828_v32  ;;  %v3915_v31 = vld [vmem:[#allocation2 + $0x664] ss:$16 sps:$4 sm:$0xff]   ;;  %v3918_v32 = vld [vmem:[#allocation2 + $0x66c] ss:$16 sps:$4 sm:$0xff]  }
  0xb7   :  { %1537 = vmatpush1.bf16.msra.mxu0 %v3823_v33  ;;  %1709 = vmatpush1.bf16.msra.mxu1 %v3826_v34  ;;  %v3913_v33 = vld [vmem:[#allocation2 + $0x660] ss:$16 sps:$4 sm:$0xff]   ;;  %v3916_v34 = vld [vmem:[#allocation2 + $0x668] ss:$16 sps:$4 sm:$0xff]  }
  0xb8   :  { %1538 = vmatprep.subr.bf16.mxu0 %v3831_v35  ;;  %1710 = vmatprep.subr.bf16.mxu1 %v3834_v36  ;;  %v3921_v35 = vld [vmem:[#allocation2 + $0x684] ss:$16 sps:$4 sm:$0xff]   ;;  %v3924_v36 = vld [vmem:[#allocation2 + $0x68c] ss:$16 sps:$4 sm:$0xff]  }
  0xbb   :  { %1539 = vmatpush1.bf16.msra.mxu0 %v3829_v37  ;;  %1711 = vmatpush1.bf16.msra.mxu1 %v3832_v38  ;;  %v3919_v37 = vld [vmem:[#allocation2 + $0x680] ss:$16 sps:$4 sm:$0xff]   ;;  %v3922_v38 = vld [vmem:[#allocation2 + $0x688] ss:$16 sps:$4 sm:$0xff]  }
  0xbc   :  { %1540 = vmatprep.subr.bf16.mxu0 %v3837_v39  ;;  %1712 = vmatprep.subr.bf16.mxu1 %v3840_v40  ;;  %v3927_v39 = vld [vmem:[#allocation2 + $0x6a4] ss:$16 sps:$4 sm:$0xff]   ;;  %v3930_v40 = vld [vmem:[#allocation2 + $0x6ac] ss:$16 sps:$4 sm:$0xff]  }
  0xbf   :  { %1541 = vmatpush1.bf16.msra.mxu0 %v3835_v41  ;;  %1713 = vmatpush1.bf16.msra.mxu1 %v3838_v42  ;;  %v3925_v41 = vld [vmem:[#allocation2 + $0x6a0] ss:$16 sps:$4 sm:$0xff]   ;;  %v3928_v42 = vld [vmem:[#allocation2 + $0x6a8] ss:$16 sps:$4 sm:$0xff]  }
  0xc0   :  { %1542 = vmatprep.subr.bf16.mxu0 %v3843_v43  ;;  %1714 = vmatprep.subr.bf16.mxu1 %v3846_v44  ;;  %v3933_v43 = vld [vmem:[#allocation2 + $0x6c4] ss:$16 sps:$4 sm:$0xff]   ;;  %v3936_v44 = vld [vmem:[#allocation2 + $0x6cc] ss:$16 sps:$4 sm:$0xff]  }
  0xc3   :  { %1543 = vmatpush1.bf16.msra.mxu0 %v3841_v45  ;;  %1715 = vmatpush1.bf16.msra.mxu1 %v3844_v46  ;;  %v3931_v45 = vld [vmem:[#allocation2 + $0x6c0] ss:$16 sps:$4 sm:$0xff]   ;;  %v3934_v46 = vld [vmem:[#allocation2 + $0x6c8] ss:$16 sps:$4 sm:$0xff]  }
  0xc4   :  { %1544 = vmatprep.subr.bf16.mxu0 %v3849_v47  ;;  %1716 = vmatprep.subr.bf16.mxu1 %v3852_v48  ;;  %v3939_v47 = vld [vmem:[#allocation2 + $0x6e4] ss:$16 sps:$4 sm:$0xff]   ;;  %v3942_v48 = vld [vmem:[#allocation2 + $0x6ec] ss:$16 sps:$4 sm:$0xff]  }
  0xc7   :  { %1545 = vmatpush1.bf16.msra.mxu0 %v3847_v49  ;;  %1717 = vmatpush1.bf16.msra.mxu1 %v3850_v50  ;;  %v3937_v49 = vld [vmem:[#allocation2 + $0x6e0] ss:$16 sps:$4 sm:$0xff]   ;;  %v3940_v50 = vld [vmem:[#allocation2 + $0x6e8] ss:$16 sps:$4 sm:$0xff]  }
  0xc8   :  { %1546 = vmatprep.subr.bf16.mxu0 %v3855_v51  ;;  %1718 = vmatprep.subr.bf16.mxu1 %v3858_v52  ;;  %v61_v51 = vld [vmem:[%s4463_s0 + $0x30] sm:$0xff]  ;;  %v68_v52 = vld [vmem:[%s4463_s0 + $0x68] sm:$0xff] }
  0xcb   :  { %1547 = vmatpush1.bf16.msra.mxu0 %v3853_v53  ;;  %1719 = vmatpush1.bf16.msra.mxu1 %v3856_v54  ;;  %v3945_v53 = vld [vmem:[#allocation4 + $0x4] ss:$16 sps:$4 sm:$0xff]   ;;  %v3948_v54 = vld [vmem:[#allocation4 + $0xc] ss:$16 sps:$4 sm:$0xff]  }
  0xcc   :  { %1548 = vmatprep.subr.bf16.mxu0 %v3861_v55  ;;  %1720 = vmatprep.subr.bf16.mxu1 %v3864_v56  ;;  %v3943_v55 = vld [vmem:[#allocation4] ss:$16 sps:$4 sm:$0xff]   ;;  %v3946_v56 = vld [vmem:[#allocation4 + $0x8] ss:$16 sps:$4 sm:$0xff]  }
  0xcf   :  { %1549 = vmatpush1.bf16.msra.mxu0 %v3859_v57  ;;  %1721 = vmatpush1.bf16.msra.mxu1 %v3862_v58  ;;  %v75_v57 = vpack.c.bf16 %v68_v52, %v61_v51  ;;  %v3951_v58 = vld [vmem:[#allocation4 + $0x24] ss:$16 sps:$4 sm:$0xff]   ;;  %v4038_v51 = vld [vmem:[#allocation4 + $0x1ec] ss:$16 sps:$4 sm:$0xff]   ;;  %v4033_v52 = vld [vmem:[#allocation4 + $0x1e0] ss:$16 sps:$4 sm:$0xff]  }
  0xd0   :  { %1550 = vmatprep.subr.bf16.mxu0 %v3867_v59  ;;  %1722 = vmatprep.subr.bf16.mxu1 %v3870_v60  ;;  %v3954_v59 = vld [vmem:[#allocation4 + $0x2c] ss:$16 sps:$4 sm:$0xff]   ;;  %v3949_v60 = vld [vmem:[#allocation4 + $0x20] ss:$16 sps:$4 sm:$0xff]  }
  0xd3   :  { %1551 = vmatpush1.bf16.msra.mxu0 %v3865_v61  ;;  %1723 = vmatpush1.bf16.msra.mxu1 %v3868_v62  ;;  %v3952_v61 = vld [vmem:[#allocation4 + $0x28] ss:$16 sps:$4 sm:$0xff]   ;;  %v3957_v62 = vld [vmem:[#allocation4 + $0x44] ss:$16 sps:$4 sm:$0xff]  }
  0xd4   :  { %1552 = vmatprep.subr.bf16.mxu0 %v3873_v63  ;;  %1724 = vmatprep.subr.bf16.mxu1 %v3876_v0  ;;  %v3960_v63 = vld [vmem:[#allocation4 + $0x4c] ss:$16 sps:$4 sm:$0xff]   ;;  %v3955_v0 = vld [vmem:[#allocation4 + $0x40] ss:$16 sps:$4 sm:$0xff]  }
  0xd7   :  { %1553 = vmatpush1.bf16.msra.mxu0 %v3871_v1  ;;  %1725 = vmatpush1.bf16.msra.mxu1 %v3874_v2  ;;  %v3958_v1 = vld [vmem:[#allocation4 + $0x48] ss:$16 sps:$4 sm:$0xff]   ;;  %v3963_v2 = vld [vmem:[#allocation4 + $0x64] ss:$16 sps:$4 sm:$0xff]  }
  0xd8   :  { %1554 = vmatprep.subr.bf16.mxu0 %v3879_v3  ;;  %1726 = vmatprep.subr.bf16.mxu1 %v3882_v4  ;;  %v3966_v3 = vld [vmem:[#allocation4 + $0x6c] ss:$16 sps:$4 sm:$0xff]   ;;  %v3961_v4 = vld [vmem:[#allocation4 + $0x60] ss:$16 sps:$4 sm:$0xff]  }
  0xdb   :  { %1555 = vmatpush1.bf16.msra.mxu0 %v3877_v5  ;;  %1727 = vmatpush1.bf16.msra.mxu1 %v3880_v6  ;;  %v3964_v5 = vld [vmem:[#allocation4 + $0x68] ss:$16 sps:$4 sm:$0xff]   ;;  %v3969_v6 = vld [vmem:[#allocation4 + $0x84] ss:$16 sps:$4 sm:$0xff]  }
  0xdc   :  { %1556 = vmatprep.subr.bf16.mxu0 %v3885_v7  ;;  %1728 = vmatprep.subr.bf16.mxu1 %v3888_v8  ;;  %v3972_v7 = vld [vmem:[#allocation4 + $0x8c] ss:$16 sps:$4 sm:$0xff]   ;;  %v3967_v8 = vld [vmem:[#allocation4 + $0x80] ss:$16 sps:$4 sm:$0xff]  }
  0xdf   :  { %1557 = vmatpush1.bf16.msra.mxu0 %v3883_v9  ;;  %1729 = vmatpush1.bf16.msra.mxu1 %v3886_v10  ;;  %v3970_v9 = vld [vmem:[#allocation4 + $0x88] ss:$16 sps:$4 sm:$0xff]   ;;  %v3975_v10 = vld [vmem:[#allocation4 + $0xa4] ss:$16 sps:$4 sm:$0xff]  }
  0xe0   :  { %1558 = vmatprep.subr.bf16.mxu0 %v3891_v11  ;;  %1730 = vmatprep.subr.bf16.mxu1 %v3894_v12  ;;  %v3978_v11 = vld [vmem:[#allocation4 + $0xac] ss:$16 sps:$4 sm:$0xff]   ;;  %v3973_v12 = vld [vmem:[#allocation4 + $0xa0] ss:$16 sps:$4 sm:$0xff]  }
  0xe3   :  { %1559 = vmatpush1.bf16.msra.mxu0 %v3889_v13  ;;  %1731 = vmatpush1.bf16.msra.mxu1 %v3892_v14  ;;  %v3976_v13 = vld [vmem:[#allocation4 + $0xa8] ss:$16 sps:$4 sm:$0xff]   ;;  %v3981_v14 = vld [vmem:[#allocation4 + $0xc4] ss:$16 sps:$4 sm:$0xff]  }
  0xe4   :  { %1571 = vmatprep.subr.bf16.mxu0 %v3897_v17  ;;  %1743 = vmatprep.subr.bf16.mxu1 %v3900_v18  ;;  %v3982_v17 = vld [vmem:[#allocation4 + $0xc8] ss:$16 sps:$4 sm:$0xff]   ;;  %v3987_v18 = vld [vmem:[#allocation4 + $0xe4] ss:$16 sps:$4 sm:$0xff]  }
  0xe6   :  { %1561 = vmatmul.mubr.bf16.vlgmr.msra.gmra.mrb[0].mxu0 %v73_v21  ;;  %1733 = vmatmul.mubr.bf16.vlgmr.msra.gmra.mrb[0].mxu1 %v73_v21  ;;  %v3988_v21 = vld [vmem:[#allocation4 + $0xe8] ss:$16 sps:$4 sm:$0xff]  }
  0xe7   :  { %1572 = vmatpush1.bf16.msra.mxu0 %v3895_v19  ;;  %1744 = vmatpush1.bf16.msra.mxu1 %v3898_v20  ;;  %v3990_v19 = vld [vmem:[#allocation4 + $0xec] ss:$16 sps:$4 sm:$0xff]   ;;  %v3985_v20 = vld [vmem:[#allocation4 + $0xe0] ss:$16 sps:$4 sm:$0xff]  }
  0xe8   :  { %1573 = vmatprep.subr.bf16.mxu0 %v3903_v22  ;;  %1745 = vmatprep.subr.bf16.mxu1 %v3906_v23  ;;  %v3993_v22 = vld [vmem:[#allocation4 + $0x104] ss:$16 sps:$4 sm:$0xff]   ;;  %v3996_v23 = vld [vmem:[#allocation4 + $0x10c] ss:$16 sps:$4 sm:$0xff]  }
  0xe9   :  { %1603 = vmatprep.mubr.bf16.mxu0 %v4219_v30  ;;  %1775 = vmatprep.mubr.bf16.mxu1 %v4219_v30  ;;  %v4005_v30 = vld [vmem:[#allocation4 + $0x144] ss:$16 sps:$4 sm:$0xff]  }
  0xeb   :  { %1574 = vmatpush1.bf16.msra.mxu0 %v3901_v24  ;;  %1746 = vmatpush1.bf16.msra.mxu1 %v3904_v25  ;;  %v3991_v24 = vld [vmem:[#allocation4 + $0x100] ss:$16 sps:$4 sm:$0xff]   ;;  %v3994_v25 = vld [vmem:[#allocation4 + $0x108] ss:$16 sps:$4 sm:$0xff]  }
  0xec   :  { %1575 = vmatprep.subr.bf16.mxu0 %v3909_v26  ;;  %1747 = vmatprep.subr.bf16.mxu1 %v3912_v27  ;;  %v3999_v26 = vld [vmem:[#allocation4 + $0x124] ss:$16 sps:$4 sm:$0xff]   ;;  %v4002_v27 = vld [vmem:[#allocation4 + $0x12c] ss:$16 sps:$4 sm:$0xff]  }
  0xef   :  { %1576 = vmatpush1.bf16.msra.mxu0 %v3907_v28  ;;  %1748 = vmatpush1.bf16.msra.mxu1 %v3910_v29  ;;  %v3997_v28 = vld [vmem:[#allocation4 + $0x120] ss:$16 sps:$4 sm:$0xff]   ;;  %v4000_v29 = vld [vmem:[#allocation4 + $0x128] ss:$16 sps:$4 sm:$0xff]  }
  0xf0   :  { %1577 = vmatprep.subr.bf16.mxu0 %v3915_v31  ;;  %1749 = vmatprep.subr.bf16.mxu1 %v3918_v32  ;;  %v4008_v31 = vld [vmem:[#allocation4 + $0x14c] ss:$16 sps:$4 sm:$0xff]   ;;  %v4003_v32 = vld [vmem:[#allocation4 + $0x140] ss:$16 sps:$4 sm:$0xff]  }
  0xf3   :  { %1578 = vmatpush1.bf16.msra.mxu0 %v3913_v33  ;;  %1750 = vmatpush1.bf16.msra.mxu1 %v3916_v34  ;;  %v4006_v33 = vld [vmem:[#allocation4 + $0x148] ss:$16 sps:$4 sm:$0xff]   ;;  %v4011_v34 = vld [vmem:[#allocation4 + $0x164] ss:$16 sps:$4 sm:$0xff]  }
  0xf4   :  { %1579 = vmatprep.subr.bf16.mxu0 %v3921_v35  ;;  %1751 = vmatprep.subr.bf16.mxu1 %v3924_v36  ;;  %v4014_v35 = vld [vmem:[#allocation4 + $0x16c] ss:$16 sps:$4 sm:$0xff]   ;;  %v4009_v36 = vld [vmem:[#allocation4 + $0x160] ss:$16 sps:$4 sm:$0xff]  }
  0xf7   :  { %1580 = vmatpush1.bf16.msra.mxu0 %v3919_v37  ;;  %1752 = vmatpush1.bf16.msra.mxu1 %v3922_v38  ;;  %v4012_v37 = vld [vmem:[#allocation4 + $0x168] ss:$16 sps:$4 sm:$0xff]   ;;  %v4017_v38 = vld [vmem:[#allocation4 + $0x184] ss:$16 sps:$4 sm:$0xff]  }
  0xf8   :  { %1581 = vmatprep.subr.bf16.mxu0 %v3927_v39  ;;  %1753 = vmatprep.subr.bf16.mxu1 %v3930_v40  ;;  %v4020_v39 = vld [vmem:[#allocation4 + $0x18c] ss:$16 sps:$4 sm:$0xff]   ;;  %v4015_v40 = vld [vmem:[#allocation4 + $0x180] ss:$16 sps:$4 sm:$0xff]  }
  0xfb   :  { %1582 = vmatpush1.bf16.msra.mxu0 %v3925_v41  ;;  %1754 = vmatpush1.bf16.msra.mxu1 %v3928_v42  ;;  %v4018_v41 = vld [vmem:[#allocation4 + $0x188] ss:$16 sps:$4 sm:$0xff]   ;;  %v4023_v42 = vld [vmem:[#allocation4 + $0x1a4] ss:$16 sps:$4 sm:$0xff]  }
  0xfc   :  { %1583 = vmatprep.subr.bf16.mxu0 %v3933_v43  ;;  %1755 = vmatprep.subr.bf16.mxu1 %v3936_v44  ;;  %v4026_v43 = vld [vmem:[#allocation4 + $0x1ac] ss:$16 sps:$4 sm:$0xff]   ;;  %v4021_v44 = vld [vmem:[#allocation4 + $0x1a0] ss:$16 sps:$4 sm:$0xff]  }
  0xff   :  { %1584 = vmatpush1.bf16.msra.mxu0 %v3931_v45  ;;  %1756 = vmatpush1.bf16.msra.mxu1 %v3934_v46  ;;  %v4024_v45 = vld [vmem:[#allocation4 + $0x1a8] ss:$16 sps:$4 sm:$0xff]   ;;  %v4029_v46 = vld [vmem:[#allocation4 + $0x1c4] ss:$16 sps:$4 sm:$0xff]  }
 0x100   :  { %1585 = vmatprep.subr.bf16.mxu0 %v3939_v47  ;;  %1757 = vmatprep.subr.bf16.mxu1 %v3942_v48  ;;  %v4032_v47 = vld [vmem:[#allocation4 + $0x1cc] ss:$16 sps:$4 sm:$0xff]   ;;  %v4027_v48 = vld [vmem:[#allocation4 + $0x1c0] ss:$16 sps:$4 sm:$0xff]  }
 0x103   :  { %1586 = vmatpush1.bf16.msra.mxu0 %v3937_v49  ;;  %1758 = vmatpush1.bf16.msra.mxu1 %v3940_v50  ;;  %v4030_v49 = vld [vmem:[#allocation4 + $0x1c8] ss:$16 sps:$4 sm:$0xff]   ;;  %v4035_v50 = vld [vmem:[#allocation4 + $0x1e4] ss:$16 sps:$4 sm:$0xff]  }
 0x104   :  { %2588 = vmatprep.subr.bf16.mxu0 %v3945_v53  ;;  %2674 = vmatprep.subr.bf16.mxu1 %v3948_v54  ;;  %v4036_v53 = vld [vmem:[#allocation4 + $0x1e8] ss:$16 sps:$4 sm:$0xff]   ;;  %v4041_v54 = vld [vmem:[#allocation4 + $0x204] ss:$16 sps:$4 sm:$0xff]  }
 0x106   :  { %1604 = vmatmul.mubr.bf16.vlgmr.msra.gmra.mrb[0].mxu0 %v75_v57  ;;  %1776 = vmatmul.mubr.bf16.vlgmr.msra.gmra.mrb[0].mxu1 %v75_v57 }
 0x107   :  { %2589 = vmatpush1.bf16.msra.mxu0 %v3943_v55  ;;  %2675 = vmatpush1.bf16.msra.mxu1 %v3946_v56  ;;  %v4044_v55 = vld [vmem:[#allocation4 + $0x20c] ss:$16 sps:$4 sm:$0xff]   ;;  %v302_v56 = vlaneseq }
 0x108   :  { %2590 = vmatprep.subr.bf16.mxu0 %v3951_v58  ;;  %2676 = vmatprep.subr.bf16.mxu1 %v3954_v59 }
 0x109   :  { %v4326_v57 = vshrl.u32 %v302_v56, 7  ;;  %v4078_v56 = vld [vmem:[#allocation4 + $0x2c8] ss:$16 sps:$4 sm:$0xff]  }
 0x10b   :  { %2591 = vmatpush1.bf16.msra.mxu0 %v3949_v60  ;;  %2677 = vmatpush1.bf16.msra.mxu1 %v3952_v61  ;;  %v304_v58 = vsub.s32 0, %v4326_v57  ;;  %v312_v59 = vsub.s32 2, %v4326_v57  ;;  %v300_v60 = vld [vmem:[%s4465_s2] sm:$0xf]  ;;  %v308_v61 = vsub.s32 1, %v4326_v57 }
 0x10c   :  { %2592 = vmatprep.subr.bf16.mxu0 %v3957_v62  ;;  %2678 = vmatprep.subr.bf16.mxu1 %v3960_v63  ;;  %v316_v62 = vsub.s32 3, %v4326_v57 }
 0x10d   :  { %v305_v63 = vrot.slane %v300_v60, %v304_v58 }
 0x10f   :  { %2593 = vmatpush1.bf16.msra.mxu0 %v3955_v0  ;;  %2679 = vmatpush1.bf16.msra.mxu1 %v3958_v1  ;;  %v313_v0 = vrot.slane %v300_v60, %v312_v59  ;;  %v309_v1 = vrot.slane %v300_v60, %v308_v61 }
 0x110   :  { %2594 = vmatprep.subr.bf16.mxu0 %v3963_v2  ;;  %2680 = vmatprep.subr.bf16.mxu1 %v3966_v3  ;;  %v317_v2 = vrot.slane %v300_v60, %v316_v62  ;;  %v4083_v60 = vld [vmem:[#allocation4 + $0x2e4] ss:$16 sps:$4 sm:$0xff]  }
 0x113   :  { %2595 = vmatpush1.bf16.msra.mxu0 %v3961_v4  ;;  %2681 = vmatpush1.bf16.msra.mxu1 %v3964_v5 }
 0x114   :  { %2596 = vmatprep.subr.bf16.mxu0 %v3969_v6  ;;  %2682 = vmatprep.subr.bf16.mxu1 %v3972_v7 }
 0x117   :  { %2597 = vmatpush1.bf16.msra.mxu0 %v3967_v8  ;;  %2683 = vmatpush1.bf16.msra.mxu1 %v3970_v9 }
 0x118   :  { %2598 = vmatprep.subr.bf16.mxu0 %v3975_v10  ;;  %2684 = vmatprep.subr.bf16.mxu1 %v3978_v11 }
 0x11b   :  { %2599 = vmatpush1.bf16.msra.mxu0 %v3973_v12  ;;  %2685 = vmatpush1.bf16.msra.mxu1 %v3976_v13 }
 0x11c   :  { %2600 = vmatprep.subr.bf16.mxu0 %v3981_v14  ;;  %2686 = vmatprep.subr.bf16.mxu1 %v3984_v15 }
 0x11f   :  { %2601 = vmatpush1.bf16.msra.mxu0 %v3979_v16  ;;  %2687 = vmatpush1.bf16.msra.mxu1 %v3982_v17 }
 0x120   :  { %2602 = vmatprep.subr.bf16.mxu0 %v3987_v18  ;;  %2688 = vmatprep.subr.bf16.mxu1 %v3990_v19 }
 0x123   :  { %2603 = vmatpush1.bf16.msra.mxu0 %v3985_v20  ;;  %2689 = vmatpush1.bf16.msra.mxu1 %v3988_v21 }
 0x124   :  { %2604 = vmatprep.subr.bf16.mxu0 %v3993_v22  ;;  %2690 = vmatprep.subr.bf16.mxu1 %v3996_v23 }
 0x127   :  { %2605 = vmatpush1.bf16.msra.mxu0 %v3991_v24  ;;  %2691 = vmatpush1.bf16.msra.mxu1 %v3994_v25 }
 0x128   :  { %2606 = vmatprep.subr.bf16.mxu0 %v3999_v26  ;;  %2692 = vmatprep.subr.bf16.mxu1 %v4002_v27 }
 0x12b   :  { %2607 = vmatpush1.bf16.msra.mxu0 %v3997_v28  ;;  %2693 = vmatpush1.bf16.msra.mxu1 %v4000_v29 }
 0x12c   :  { %2608 = vmatprep.subr.bf16.mxu0 %v4005_v30  ;;  %2694 = vmatprep.subr.bf16.mxu1 %v4008_v31  ;;  %v4039_v31 = vld [vmem:[#allocation4 + $0x200] ss:$16 sps:$4 sm:$0xff]  }
 0x12f   :  { %2609 = vmatpush1.bf16.msra.mxu0 %v4003_v32  ;;  %2695 = vmatpush1.bf16.msra.mxu1 %v4006_v33  ;;  %v4042_v32 = vld [vmem:[#allocation4 + $0x208] ss:$16 sps:$4 sm:$0xff]   ;;  %v4047_v33 = vld [vmem:[#allocation4 + $0x224] ss:$16 sps:$4 sm:$0xff]  }
 0x130   :  { %2610 = vmatprep.subr.bf16.mxu0 %v4011_v34  ;;  %2696 = vmatprep.subr.bf16.mxu1 %v4014_v35  ;;  %v4050_v34 = vld [vmem:[#allocation4 + $0x22c] ss:$16 sps:$4 sm:$0xff]   ;;  %v4045_v35 = vld [vmem:[#allocation4 + $0x220] ss:$16 sps:$4 sm:$0xff]  }
 0x133   :  { %2611 = vmatpush1.bf16.msra.mxu0 %v4009_v36  ;;  %2697 = vmatpush1.bf16.msra.mxu1 %v4012_v37  ;;  %v4048_v36 = vld [vmem:[#allocation4 + $0x228] ss:$16 sps:$4 sm:$0xff]   ;;  %v4053_v37 = vld [vmem:[#allocation4 + $0x244] ss:$16 sps:$4 sm:$0xff]  }
 0x134   :  { %2612 = vmatprep.subr.bf16.mxu0 %v4017_v38  ;;  %2698 = vmatprep.subr.bf16.mxu1 %v4020_v39  ;;  %v4056_v38 = vld [vmem:[#allocation4 + $0x24c] ss:$16 sps:$4 sm:$0xff]   ;;  %v4051_v39 = vld [vmem:[#allocation4 + $0x240] ss:$16 sps:$4 sm:$0xff]  }
 0x137   :  { %2613 = vmatpush1.bf16.msra.mxu0 %v4015_v40  ;;  %2699 = vmatpush1.bf16.msra.mxu1 %v4018_v41  ;;  %v4054_v40 = vld [vmem:[#allocation4 + $0x248] ss:$16 sps:$4 sm:$0xff]   ;;  %v4059_v41 = vld [vmem:[#allocation4 + $0x264] ss:$16 sps:$4 sm:$0xff]  }
 0x138   :  { %2614 = vmatprep.subr.bf16.mxu0 %v4023_v42  ;;  %2700 = vmatprep.subr.bf16.mxu1 %v4026_v43  ;;  %v4062_v42 = vld [vmem:[#allocation4 + $0x26c] ss:$16 sps:$4 sm:$0xff]   ;;  %v4057_v43 = vld [vmem:[#allocation4 + $0x260] ss:$16 sps:$4 sm:$0xff]  }
 0x13b   :  { %2615 = vmatpush1.bf16.msra.mxu0 %v4021_v44  ;;  %2701 = vmatpush1.bf16.msra.mxu1 %v4024_v45  ;;  %v4060_v44 = vld [vmem:[#allocation4 + $0x268] ss:$16 sps:$4 sm:$0xff]   ;;  %v4065_v45 = vld [vmem:[#allocation4 + $0x284] ss:$16 sps:$4 sm:$0xff]  }
 0x13c   :  { %2616 = vmatprep.subr.bf16.mxu0 %v4029_v46  ;;  %2702 = vmatprep.subr.bf16.mxu1 %v4032_v47  ;;  %v4068_v46 = vld [vmem:[#allocation4 + $0x28c] ss:$16 sps:$4 sm:$0xff]   ;;  %v4063_v47 = vld [vmem:[#allocation4 + $0x280] ss:$16 sps:$4 sm:$0xff]  }
 0x13f   :  { %2617 = vmatpush1.bf16.msra.mxu0 %v4027_v48  ;;  %2703 = vmatpush1.bf16.msra.mxu1 %v4030_v49  ;;  %v4066_v48 = vld [vmem:[#allocation4 + $0x288] ss:$16 sps:$4 sm:$0xff]   ;;  %v4071_v49 = vld [vmem:[#allocation4 + $0x2a4] ss:$16 sps:$4 sm:$0xff]  }
 0x140   :  { %2618 = vmatprep.subr.bf16.mxu0 %v4035_v50  ;;  %2704 = vmatprep.subr.bf16.mxu1 %v4038_v51  ;;  %v4074_v50 = vld [vmem:[#allocation4 + $0x2ac] ss:$16 sps:$4 sm:$0xff]   ;;  %v4069_v51 = vld [vmem:[#allocation4 + $0x2a0] ss:$16 sps:$4 sm:$0xff]  }
 0x143   :  { %2619 = vmatpush1.bf16.msra.mxu0 %v4033_v52  ;;  %2705 = vmatpush1.bf16.msra.mxu1 %v4036_v53  ;;  %v4072_v52 = vld [vmem:[#allocation4 + $0x2a8] ss:$16 sps:$4 sm:$0xff]   ;;  %v4077_v53 = vld [vmem:[#allocation4 + $0x2c4] ss:$16 sps:$4 sm:$0xff]  }
 0x144   :  { %2631 = vmatprep.subr.bf16.mxu0 %v4041_v54  ;;  %2717 = vmatprep.subr.bf16.mxu1 %v4044_v55  ;;  %v4080_v54 = vld [vmem:[#allocation4 + $0x2cc] ss:$16 sps:$4 sm:$0xff]   ;;  %v4075_v55 = vld [vmem:[#allocation4 + $0x2c0] ss:$16 sps:$4 sm:$0xff]  }
 0x1d9   :  { %v1605_v3 = vpop.f32.mrb[0].mxu0  ;;  %v1777_v4 = vpop.f32.mrb[0].mxu1 }
 0x1da   :  { %v3554_v5 = vadd.f32 %v1605_v3, %v305_v63  ;;  %v3558_v6 = vadd.f32 %v1777_v4, %v313_v0  ;;  %v1607_v7 = vpop.f32.mrb[1].mxu0  ;;  %v1779_v8 = vpop.f32.mrb[1].mxu1  ;;  %v4092_v3 = vld [vmem:[#allocation4 + $0x30c] ss:$16 sps:$4 sm:$0xff]   ;;  %v4087_v4 = vld [vmem:[#allocation4 + $0x300] ss:$16 sps:$4 sm:$0xff]  }
 0x1db   :  { %v3555_v9 = vadd.f32 %v1607_v7, %v309_v1  ;;  %v3559_v10 = vadd.f32 %v1779_v8, %v317_v2  ;;  %v1609_v11 = vpop.f32.mrb[2].mxu0  ;;  %v1781_v12 = vpop.f32.mrb[2].mxu1  ;;  %v4098_v7 = vld [vmem:[#allocation4 + $0x32c] ss:$16 sps:$4 sm:$0xff]   ;;  %v4093_v8 = vld [vmem:[#allocation4 + $0x320] ss:$16 sps:$4 sm:$0xff]  }
 0x1dc   :  { %v3556_v13 = vadd.f32 %v1609_v11, %v305_v63  ;;  %v3560_v14 = vadd.f32 %v1781_v12, %v313_v0  ;;  %v1611_v15 = vpop.f32.mrb[3].mxu0  ;;  %v1783_v16 = vpop.f32.mrb[3].mxu1  ;;  %v1786_v19 = vmax.f32 %v3554_v5, 0.0  ;;  %v1788_v20 = vmax.f32 %v3558_v6, 0.0  ;;  %v4086_v63 = vld [vmem:[#allocation4 + $0x2ec] ss:$16 sps:$4 sm:$0xff]  }
 0x1dd   :  { %v3557_v17 = vadd.f32 %v1611_v15, %v309_v1  ;;  %v3561_v18 = vadd.f32 %v1783_v16, %v317_v2  ;;  %v1787_v23 = vmax.f32 %v3555_v9, 0.0  ;;  %v1789_v24 = vmax.f32 %v3559_v10, 0.0  ;;  %v4081_v0 = vld [vmem:[#allocation4 + $0x2e0] ss:$16 sps:$4 sm:$0xff]   ;;  %v4084_v1 = vld [vmem:[#allocation4 + $0x2e8] ss:$16 sps:$4 sm:$0xff]  }
 0x1de   :  { %v1790_v21 = vmax.f32 %v3556_v13, 0.0  ;;  %v1792_v22 = vmax.f32 %v3560_v14, 0.0  ;;  %v4089_v2 = vld [vmem:[#allocation4 + $0x304] ss:$16 sps:$4 sm:$0xff]   ;;  %v4090_v5 = vld [vmem:[#allocation4 + $0x308] ss:$16 sps:$4 sm:$0xff]  }
 0x1df   :  { %v1791_v25 = vmax.f32 %v3557_v17, 0.0  ;;  %v1793_v26 = vmax.f32 %v3561_v18, 0.0  ;;  %v4095_v6 = vld [vmem:[#allocation4 + $0x324] ss:$16 sps:$4 sm:$0xff]   ;;  %v4096_v9 = vld [vmem:[#allocation4 + $0x328] ss:$16 sps:$4 sm:$0xff]  }
 0x1e0   :  { %v1794_v27 = vpack.c.bf16 %v1790_v21, %v1786_v19  ;;  %v4343_v28 = vpack.c.bf16 %v1792_v22, %v1788_v20  ;;  %v4101_v10 = vld [vmem:[#allocation4 + $0x344] ss:$16 sps:$4 sm:$0xff]   ;;  %v4104_v11 = vld [vmem:[#allocation4 + $0x34c] ss:$16 sps:$4 sm:$0xff]   ;;  %v4099_v12 = vld [vmem:[#allocation4 + $0x340] ss:$16 sps:$4 sm:$0xff]  }
 0x1e1   :  { %v1795_v29 = vpack.c.bf16 %v1791_v25, %v1787_v23  ;;  %v1797_v30 = vpack.c.bf16 %v1793_v26, %v1789_v24  ;;  %v4102_v13 = vld [vmem:[#allocation4 + $0x348] ss:$16 sps:$4 sm:$0xff]   ;;  %v4107_v14 = vld [vmem:[#allocation4 + $0x364] ss:$16 sps:$4 sm:$0xff]   ;;  %v4110_v15 = vld [vmem:[#allocation4 + $0x36c] ss:$16 sps:$4 sm:$0xff]  }
 0x1e2   :  { %v4105_v16 = vld [vmem:[#allocation4 + $0x360] ss:$16 sps:$4 sm:$0xff]   ;;  %v4108_v17 = vld [vmem:[#allocation4 + $0x368] ss:$16 sps:$4 sm:$0xff]   ;;  %v4113_v18 = vld [vmem:[#allocation4 + $0x384] ss:$16 sps:$4 sm:$0xff]  }
 0x1e3   :  { %2620 = vmatprep.mubr.bf16.mxu0 %v1795_v29  ;;  %2706 = vmatprep.mubr.bf16.mxu1 %v1795_v29  ;;  %v4116_v19 = vld [vmem:[#allocation4 + $0x38c] ss:$16 sps:$4 sm:$0xff]   ;;  %v4111_v20 = vld [vmem:[#allocation4 + $0x380] ss:$16 sps:$4 sm:$0xff]   ;;  %v4114_v21 = vld [vmem:[#allocation4 + $0x388] ss:$16 sps:$4 sm:$0xff]  }
 0x1e4   :  { %2621 = vmatmul.mubr.bf16.vlgmr.msra.gmra.mrb[4].mxu0 %v1794_v27  ;;  %2707 = vmatmul.mubr.bf16.vlgmr.msra.gmra.mrb[4].mxu1 %v1794_v27  ;;  %v4119_v22 = vld [vmem:[#allocation4 + $0x3a4] ss:$16 sps:$4 sm:$0xff]   ;;  %v4122_v23 = vld [vmem:[#allocation4 + $0x3ac] ss:$16 sps:$4 sm:$0xff]   ;;  %v4117_v24 = vld [vmem:[#allocation4 + $0x3a0] ss:$16 sps:$4 sm:$0xff]  }
 0x1e5   :  { %2632 = vmatpush1.bf16.msra.mxu0 %v4039_v31  ;;  %2718 = vmatpush1.bf16.msra.mxu1 %v4042_v32  ;;  %v4120_v25 = vld [vmem:[#allocation4 + $0x3a8] ss:$16 sps:$4 sm:$0xff]   ;;  %v4125_v26 = vld [vmem:[#allocation4 + $0x3c4] ss:$16 sps:$4 sm:$0xff]   ;;  %v4128_v27 = vld [vmem:[#allocation4 + $0x3cc] ss:$16 sps:$4 sm:$0xff]  }
 0x1e6   :  { %2663 = vmatprep.mubr.bf16.mxu0 %v1797_v30  ;;  %2749 = vmatprep.mubr.bf16.mxu1 %v1797_v30  ;;  %v4123_v29 = vld [vmem:[#allocation4 + $0x3c0] ss:$16 sps:$4 sm:$0xff]   ;;  %v4126_v30 = vld [vmem:[#allocation4 + $0x3c8] ss:$16 sps:$4 sm:$0xff]   ;;  %v4131_v31 = vld [vmem:[#allocation4 + $0x3e4] ss:$16 sps:$4 sm:$0xff]  }
 0x1e7   :  { %2633 = vmatprep.subr.bf16.mxu0 %v4047_v33  ;;  %2719 = vmatprep.subr.bf16.mxu1 %v4050_v34  ;;  %v4134_v32 = vld [vmem:[#allocation4 + $0x3ec] ss:$16 sps:$4 sm:$0xff]   ;;  %v4129_v33 = vld [vmem:[#allocation4 + $0x3e0] ss:$16 sps:$4 sm:$0xff]   ;;  %v4132_v34 = vld [vmem:[#allocation4 + $0x3e8] ss:$16 sps:$4 sm:$0xff]  }
 0x1e9   :  { %2634 = vmatpush1.bf16.msra.mxu0 %v4045_v35  ;;  %2720 = vmatpush1.bf16.msra.mxu1 %v4048_v36  ;;  %v4135_v35 = vld [vmem:[%s4468_s5 + $0x40] sm:$0xff]  }
 0x1ea   :  { %2635 = vmatprep.subr.bf16.mxu0 %v4053_v37  ;;  %2721 = vmatprep.subr.bf16.mxu1 %v4056_v38  ;;  %v4136_v36 = vld [vmem:[%s4468_s5 + $0xc0] sm:$0xff]  }
 0x1eb   :  { %v4137_v37 = vld [vmem:[%s4468_s5] sm:$0xff]  }
 0x1ec   :  { %v4138_v38 = vld [vmem:[%s4468_s5 + $0x80] sm:$0xff]  }
 0x1ed   :  { %2636 = vmatpush1.bf16.msra.mxu0 %v4051_v39  ;;  %2722 = vmatpush1.bf16.msra.mxu1 %v4054_v40  ;;  %v4139_v39 = vld [vmem:[%s4468_s5 + $0x48] sm:$0xff]  }
 0x1ee   :  { %2637 = vmatprep.subr.bf16.mxu0 %v4059_v41  ;;  %2723 = vmatprep.subr.bf16.mxu1 %v4062_v42  ;;  %v4140_v40 = vld [vmem:[%s4468_s5 + $0xc8] sm:$0xff]  }
 0x1ef   :  { %v4141_v41 = vld [vmem:[%s4468_s5 + $0x8] sm:$0xff]  }
 0x1f0   :  { %v4142_v42 = vld [vmem:[%s4468_s5 + $0x88] sm:$0xff]  }
 0x1f1   :  { %2638 = vmatpush1.bf16.msra.mxu0 %v4057_v43  ;;  %2724 = vmatpush1.bf16.msra.mxu1 %v4060_v44  ;;  %v4143_v43 = vld [vmem:[%s4468_s5 + $0x50] sm:$0xff]  }
 0x1f2   :  { %2639 = vmatprep.subr.bf16.mxu0 %v4065_v45  ;;  %2725 = vmatprep.subr.bf16.mxu1 %v4068_v46  ;;  %v4145_v44 = vld [vmem:[%s4468_s5 + $0x10] sm:$0xff]   ;;  %v4147_v46 = vld [vmem:[%s4468_s5 + $0x58] sm:$0xff]  }
 0x1f3   :  { %v4146_v45 = vld [vmem:[%s4468_s5 + $0x90] sm:$0xff]  }
 0x1f5   :  { %2640 = vmatpush1.bf16.msra.mxu0 %v4063_v47  ;;  %2726 = vmatpush1.bf16.msra.mxu1 %v4066_v48  ;;  %v4148_v47 = vld [vmem:[%s4468_s5 + $0xd8] sm:$0xff]  }
 0x1f6   :  { %2641 = vmatprep.subr.bf16.mxu0 %v4071_v49  ;;  %2727 = vmatprep.subr.bf16.mxu1 %v4074_v50  ;;  %v4149_v48 = vld [vmem:[%s4468_s5 + $0x18] sm:$0xff]   ;;  %v4151_v50 = vld [vmem:[%s4468_s5 + $0x60] sm:$0xff]  }
 0x1f7   :  { %v4150_v49 = vld [vmem:[%s4468_s5 + $0x98] sm:$0xff]  }
 0x1f9   :  { %2642 = vmatpush1.bf16.msra.mxu0 %v4069_v51  ;;  %2728 = vmatpush1.bf16.msra.mxu1 %v4072_v52  ;;  %v4152_v51 = vld [vmem:[%s4468_s5 + $0xe0] sm:$0xff]  }
 0x1fa   :  { %2643 = vmatprep.subr.bf16.mxu0 %v4077_v53  ;;  %2729 = vmatprep.subr.bf16.mxu1 %v4080_v54  ;;  %v4153_v52 = vld [vmem:[%s4468_s5 + $0x20] sm:$0xff]   ;;  %v4155_v54 = vld [vmem:[%s4468_s5 + $0x68] sm:$0xff]  }
 0x1fb   :  { %v4154_v53 = vld [vmem:[%s4468_s5 + $0xa0] sm:$0xff]  }
 0x1fd   :  { %2644 = vmatpush1.bf16.msra.mxu0 %v4075_v55  ;;  %2730 = vmatpush1.bf16.msra.mxu1 %v4078_v56  ;;  %v4156_v55 = vld [vmem:[%s4468_s5 + $0xe8] sm:$0xff]  }
 0x1fe   :  { %2645 = vmatprep.subr.bf16.mxu0 %v4083_v60  ;;  %2731 = vmatprep.subr.bf16.mxu1 %v4086_v63  ;;  %v4157_v56 = vld [vmem:[%s4468_s5 + $0x28] sm:$0xff]   ;;  %v4159_v63 = vld [vmem:[%s4468_s5 + $0x70] sm:$0xff]  }
 0x1ff   :  { %v4158_v60 = vld [vmem:[%s4468_s5 + $0xa8] sm:$0xff]  }
 0x201   :  { %2646 = vmatpush1.bf16.msra.mxu0 %v4081_v0  ;;  %2732 = vmatpush1.bf16.msra.mxu1 %v4084_v1  ;;  %v4160_v0 = vld [vmem:[%s4468_s5 + $0xf0] sm:$0xff]  }
 0x202   :  { %2647 = vmatprep.subr.bf16.mxu0 %v4089_v2  ;;  %2733 = vmatprep.subr.bf16.mxu1 %v4092_v3  ;;  %v4161_v1 = vld [vmem:[%s4468_s5 + $0x30] sm:$0xff]   ;;  %v4163_v3 = vld [vmem:[%s4468_s5 + $0x78] sm:$0xff]  }
 0x203   :  { %v4162_v2 = vld [vmem:[%s4468_s5 + $0xb0] sm:$0xff]  }
 0x205   :  { %2648 = vmatpush1.bf16.msra.mxu0 %v4087_v4  ;;  %2734 = vmatpush1.bf16.msra.mxu1 %v4090_v5  ;;  %v4164_v4 = vld [vmem:[%s4468_s5 + $0xf8] sm:$0xff]  }
 0x206   :  { %2649 = vmatprep.subr.bf16.mxu0 %v4095_v6  ;;  %2735 = vmatprep.subr.bf16.mxu1 %v4098_v7  ;;  %v4165_v5 = vld [vmem:[%s4468_s5 + $0x38] sm:$0xff]   ;;  %v1926_v7 = vld [vmem:[%s4467_s4] sm:$0xf] }
 0x207   :  { %v4166_v6 = vld [vmem:[%s4468_s5 + $0xb8] sm:$0xff]  }
 0x209   :  { %2650 = vmatpush1.bf16.msra.mxu0 %v4093_v8  ;;  %2736 = vmatpush1.bf16.msra.mxu1 %v4096_v9  ;;  %v1931_v8 = vrot.slane %v1926_v7, %v304_v58  ;;  %v1939_v9 = vrot.slane %v1926_v7, %v312_v59 }
 0x20a   :  { %2651 = vmatprep.subr.bf16.mxu0 %v4101_v10  ;;  %2737 = vmatprep.subr.bf16.mxu1 %v4104_v11  ;;  %v1935_v10 = vrot.slane %v1926_v7, %v308_v61  ;;  %v1943_v11 = vrot.slane %v1926_v7, %v316_v62 }
 0x20d   :  { %2652 = vmatpush1.bf16.msra.mxu0 %v4099_v12  ;;  %2738 = vmatpush1.bf16.msra.mxu1 %v4102_v13 }
 0x20e   :  { %2653 = vmatprep.subr.bf16.mxu0 %v4107_v14  ;;  %2739 = vmatprep.subr.bf16.mxu1 %v4110_v15 }
 0x211   :  { %2654 = vmatpush1.bf16.msra.mxu0 %v4105_v16  ;;  %2740 = vmatpush1.bf16.msra.mxu1 %v4108_v17 }
 0x212   :  { %2655 = vmatprep.subr.bf16.mxu0 %v4113_v18  ;;  %2741 = vmatprep.subr.bf16.mxu1 %v4116_v19 }
 0x215   :  { %2656 = vmatpush1.bf16.msra.mxu0 %v4111_v20  ;;  %2742 = vmatpush1.bf16.msra.mxu1 %v4114_v21 }
 0x216   :  { %2657 = vmatprep.subr.bf16.mxu0 %v4119_v22  ;;  %2743 = vmatprep.subr.bf16.mxu1 %v4122_v23 }
 0x219   :  { %2658 = vmatpush1.bf16.msra.mxu0 %v4117_v24  ;;  %2744 = vmatpush1.bf16.msra.mxu1 %v4120_v25 }
 0x21a   :  { %2659 = vmatprep.subr.bf16.mxu0 %v4125_v26  ;;  %2745 = vmatprep.subr.bf16.mxu1 %v4128_v27 }
 0x21d   :  { %2660 = vmatpush1.bf16.msra.mxu0 %v4123_v29  ;;  %2746 = vmatpush1.bf16.msra.mxu1 %v4126_v30 }
 0x21e   :  { %2661 = vmatprep.subr.bf16.mxu0 %v4131_v31  ;;  %2747 = vmatprep.subr.bf16.mxu1 %v4134_v32 }
 0x221   :  { %2662 = vmatpush1.bf16.msra.mxu0 %v4129_v33  ;;  %2748 = vmatpush1.bf16.msra.mxu1 %v4132_v34 }
 0x222   :  { %3510 = vmatprep.subr.bf16.mxu0 %v4135_v35  ;;  %3532 = vmatprep.subr.bf16.mxu1 %v4136_v36 }
 0x224   :  { %2664 = vmatmul.mubr.bf16.vlgmr.msra.gmra.mrb[4].mxu0 %v4343_v28  ;;  %2750 = vmatmul.mubr.bf16.vlgmr.msra.gmra.mrb[4].mxu1 %v4343_v28  ;;  %v4144_v28 = vld [vmem:[%s4468_s5 + $0xd0] sm:$0xff]  }
 0x225   :  { %3511 = vmatpush3.bf16.msra.mxu0 %v4137_v37  ;;  %3533 = vmatpush3.bf16.msra.mxu1 %v4138_v38  ;;  %v3477_v38 = vld [vmem:[%s4469_s6] ss:$0 sm:$0xff] }
 0x226   :  { %3512 = vmatprep.subr.bf16.mxu0 %v4139_v39  ;;  %3534 = vmatprep.subr.bf16.mxu1 %v4140_v40 }
 0x229   :  { %3513 = vmatpush3.bf16.msra.mxu0 %v4141_v41  ;;  %3535 = vmatpush3.bf16.msra.mxu1 %v4142_v42 }
 0x22a   :  { %3514 = vmatprep.subr.bf16.mxu0 %v4143_v43  ;;  %3536 = vmatprep.subr.bf16.mxu1 %v4144_v28 }
 0x22d   :  { %3515 = vmatpush3.bf16.msra.mxu0 %v4145_v44  ;;  %3537 = vmatpush3.bf16.msra.mxu1 %v4146_v45 }
 0x22e   :  { %3516 = vmatprep.subr.bf16.mxu0 %v4147_v46  ;;  %3538 = vmatprep.subr.bf16.mxu1 %v4148_v47 }
 0x231   :  { %3517 = vmatpush3.bf16.msra.mxu0 %v4149_v48  ;;  %3539 = vmatpush3.bf16.msra.mxu1 %v4150_v49 }
 0x232   :  { %3518 = vmatprep.subr.bf16.mxu0 %v4151_v50  ;;  %3540 = vmatprep.subr.bf16.mxu1 %v4152_v51 }
 0x235   :  { %3519 = vmatpush3.bf16.msra.mxu0 %v4153_v52  ;;  %3541 = vmatpush3.bf16.msra.mxu1 %v4154_v53 }
 0x236   :  { %3520 = vmatprep.subr.bf16.mxu0 %v4155_v54  ;;  %3542 = vmatprep.subr.bf16.mxu1 %v4156_v55 }
 0x239   :  { %3521 = vmatpush3.bf16.msra.mxu0 %v4157_v56  ;;  %3543 = vmatpush3.bf16.msra.mxu1 %v4158_v60 }
 0x23a   :  { %3522 = vmatprep.subr.bf16.mxu0 %v4159_v63  ;;  %3544 = vmatprep.subr.bf16.mxu1 %v4160_v0 }
 0x23d   :  { %3523 = vmatpush3.bf16.msra.mxu0 %v4161_v1  ;;  %3545 = vmatpush3.bf16.msra.mxu1 %v4162_v2 }
 0x23e   :  { %3524 = vmatprep.subr.bf16.mxu0 %v4163_v3  ;;  %3546 = vmatprep.subr.bf16.mxu1 %v4164_v4 }
 0x241   :  { %3525 = vmatpush3.bf16.msra.mxu0 %v4165_v5  ;;  %3547 = vmatpush3.bf16.msra.mxu1 %v4166_v6 }
 0x2f7   :  { %v2665_v12 = vpop.f32.mrb[4].mxu0  ;;  %v2751_v13 = vpop.f32.mrb[4].mxu1 }
 0x2f8   :  { %v3562_v14 = vadd.f32 %v2665_v12, %v1931_v8  ;;  %v3566_v15 = vadd.f32 %v2751_v13, %v1939_v9  ;;  %v2667_v16 = vpop.f32.mrb[5].mxu0  ;;  %v2753_v17 = vpop.f32.mrb[5].mxu1 }
 0x2f9   :  { %v3563_v18 = vadd.f32 %v2667_v16, %v1935_v10  ;;  %v3567_v19 = vadd.f32 %v2753_v17, %v1943_v11  ;;  %v2669_v20 = vpop.f32.mrb[6].mxu0  ;;  %v2755_v21 = vpop.f32.mrb[6].mxu1 }
 0x2fa   :  { %v3564_v58 = vadd.f32 %v2669_v20, %v1931_v8  ;;  %v3568_v22 = vadd.f32 %v2755_v21, %v1939_v9  ;;  %v2671_v23 = vpop.f32.mrb[7].mxu0  ;;  %v2757_v59 = vpop.f32.mrb[7].mxu1  ;;  %v2760_v61 = vmax.f32 %v3562_v14, 0.0  ;;  %v2762_v26 = vmax.f32 %v3566_v15, 0.0 }
 0x2fb   :  { %v3565_v24 = vadd.f32 %v2671_v23, %v1935_v10  ;;  %v3569_v25 = vadd.f32 %v2757_v59, %v1943_v11  ;;  %v2761_v27 = vmax.f32 %v3563_v18, 0.0  ;;  %v2763_v29 = vmax.f32 %v3567_v19, 0.0 }
 0x2fc   :  { %v2764_v57 = vmax.f32 %v3564_v58, 0.0  ;;  %v2766_v62 = vmax.f32 %v3568_v22, 0.0 }
 0x2fd   :  { %v2765_v30 = vmax.f32 %v3565_v24, 0.0  ;;  %v2767_v31 = vmax.f32 %v3569_v25, 0.0 }
 0x2fe   :  { %v2768_v32 = vpack.c.bf16 %v2764_v57, %v2760_v61  ;;  %v2770_v33 = vpack.c.bf16 %v2766_v62, %v2762_v26 }
 0x2ff   :  { %v2769_v34 = vpack.c.bf16 %v2765_v30, %v2761_v27  ;;  %v2771_v35 = vpack.c.bf16 %v2767_v31, %v2763_v29 }
 0x301   :  { %3067 = vmatprep.mubr.bf16.mxu0 %v2769_v34  ;;  %3108 = vmatprep.mubr.bf16.mxu1 %v2771_v35 }
 0x302   :  { %3068 = vmatmul.mubr.bf16.vlgmr.msra.gmra.mrb[8].mxu0 %v2768_v32  ;;  %3109 = vmatmul.mubr.bf16.vlgmr.msra.gmra.mrb[8].mxu1 %v2770_v33 }
 0x3d5   :  { %v3526_v36 = vpop.f32.mrb[8].mxu0  ;;  %v3548_v37 = vpop.f32.mrb[8].mxu1 }
 0x3d6   :  { %v3527_v39 = vpop.f32.mrb[9].mxu0  ;;  %v3549_v40 = vpop.f32.mrb[9].mxu1 }
 0x3d7   :  { %v3528_v41 = vadd.f32 %v3527_v39, %v3526_v36  ;;  %v3550_v42 = vadd.f32 %v3549_v40, %v3548_v37  ;;  %v3529_v43 = vpop.f32.mrb[10].mxu0  ;;  %v3551_v28 = vpop.f32.mrb[10].mxu1 }
 0x3d8   :  { %v3530_v44 = vpop.f32.mrb[11].mxu0  ;;  %v3552_v45 = vpop.f32.mrb[11].mxu1 }
 0x3d9   :  { %v3070_v46 = vadd.f32 %v3528_v41, %v3477_v38  ;;  %v3531_v47 = vadd.f32 %v3530_v44, %v3529_v43  ;;  %v3553_v48 = vadd.f32 %v3552_v45, %v3551_v28 }
 0x3db   :  { %v3111_v49 = vadd.f32 %v3550_v42, %v3070_v46  ;;  %v3073_v50 = vadd.f32 %v3531_v47, %v3477_v38 }
 0x3dd   :  { %3117 = vst [vmem:[%s4470_s7] sm:$0xff] %v3111_v49  ;;  %v3114_v51 = vadd.f32 %v3553_v48, %v3073_v50 }
 0x3df   :  { %3118 = vst [vmem:[%s4470_s7 + $0x8] sm:$0xff] %v3114_v51 }
 0x3e0   :  { %3123 = vsyncpa [#allocation3], 1 }
 0x3e1   :  { %3124 = vsyncpa [#allocation5], 1 }

</bundles_post_ra>
